<compile_context>
chip_gen: v7x
topology: tpu7x:2x2x1
jax: 0.10.0
libtpu: 0.0.40
codegen_flags: <defaults>
</compile_context>

<pallas_src>
import jax
import jax.numpy as jnp
from jax.experimental import pallas as pl
from jax.experimental.pallas import tpu as pltpu

LN_EPS = 1e-5
C_PAD = 128  # lane-dense channel padding (one full vreg lane width)


# ----------------------------------------------------------------------------
# Fused kernel: embeddings -> conv/relu/LN stack -> projection -> softmax
# ----------------------------------------------------------------------------
def _make_fused_kernel(T, K, n_layers, C, n_bins, V, f0_pred):
    pad = (K - 1) // 2
    inv_c = 1.0 / float(C)

    def kernel(tok_ref, gst_ref, emb_ref, wc_ref, bc_ref, gamma_ref, beta_ref,
               wp_ref, bp_ref, o_ref):
        bt = tok_ref.shape[0]       # rows in this block (= b_tile * T)
        vp = emb_ref.shape[0]       # padded (token + gst) table rows
        cp = emb_ref.shape[1]       # 128 padded channels

        # ---- two-hot embedding gather: ONE bf16 MXU matmul --------------------
        # token rows occupy lanes [0:emb_dim], gst rows lanes [emb_dim:emb+gst] of
        # the stacked table, so selecting both rows and summing == concat, 0-padded.
        # TODO(synk): for realistic vocabularies (n_tokens >> 128) replace this
        # one-hot gather with a scalar-prefetch / pl.Element row gather.
        tok = tok_ref[...]                                              # (bt, 1) i32
        gst = gst_ref[...]                                              # (bt, 1) i32
        col = jax.lax.broadcasted_iota(jnp.int32, (bt, vp), 1)
        hit = jnp.logical_or(col == tok, col == (gst + V))
        twohot = jnp.where(hit, 1.0, 0.0).astype(jnp.bfloat16)          # (bt, vp)
        x = jnp.dot(twohot, emb_ref[...],
                    preferred_element_type=jnp.float32)                 # (bt, cp) f32

        # ---- hoisted iotas / masks (do NOT re-emit per layer) -----------------
        t_idx = jax.lax.broadcasted_iota(jnp.int32, (bt, 1), 0) % T
        lane = jax.lax.broadcasted_iota(jnp.int32, (bt, cp), 1)
        ch_mask = lane < C                                              # true channels
        shift_mask = {}
        for j in range(K):
            s = j - pad
            if s != 0 and s not in shift_mask:
                valid = jnp.logical_and(t_idx + s >= 0, t_idx + s < T)  # (bt, 1)
                shift_mask[s] = jnp.broadcast_to(valid, (bt, cp))       # (bt, cp) bool

        # ---- [Conv1d -> ReLU -> LayerNorm (-> +residual)] x n_layers -----------
        for l in range(n_layers):
            xb = x.astype(jnp.bfloat16)
            acc = None
            for j in range(K):
                s = j - pad
                if s == 0:
                    tap = xb
                else:
                    # sublane roll (XLU) + mask kills rows that would cross a
                    # sequence boundary (roll wrap is masked too).
                    rolled = pltpu.roll(x, (-s) % bt, axis=0)
                    tap = jnp.where(shift_mask[s], rolled, 0.0).astype(jnp.bfloat16)
                term = jnp.dot(tap, wc_ref[l * K + j],
                               preferred_element_type=jnp.float32)      # (bt, cp)
                acc = term if acc is None else acc + term
            h = jnp.maximum(acc + bc_ref[l], 0.0)                       # bias + ReLU
            # LayerNorm over the true C channels only (padded lanes are zero/masked)
            mean = jnp.sum(h, axis=-1, keepdims=True) * inv_c
            d = jnp.where(ch_mask, h - mean, 0.0)
            var = jnp.sum(d * d, axis=-1, keepdims=True) * inv_c
            y = d * jax.lax.rsqrt(var + LN_EPS) * gamma_ref[l] + beta_ref[l]
            # Dropout: identity in eval.  Residual only for layers > 0 (as in module).
            x = y + x if l > 0 else y

        # ---- Linear(channels, n_bins) + softmax / sigmoid ----------------------
        logits = jnp.dot(x.astype(jnp.bfloat16), wp_ref[...],
                         preferred_element_type=jnp.float32) + bp_ref[...]
        if f0_pred == "argmax":
            masked = jnp.where(lane < n_bins, logits, -1e30)
            m = jnp.max(masked, axis=-1, keepdims=True)
            e = jnp.exp(masked - m)
            denom = jnp.sum(e, axis=-1, keepdims=True)
            p = e * pl.reciprocal(denom, approx=False)
        elif f0_pred == "mean":
            p = pl.reciprocal(1.0 + jnp.exp(-logits), approx=False)
        else:
            raise NotImplementedError(f0_pred)
        # lane-dense store of the whole 128-wide slab; wrapper slices [:, :n_bins]
        o_ref[...] = p.astype(o_ref.dtype)

    return kernel


# ----------------------------------------------------------------------------
# Wrapper: batch-tiled grid, weights resident, lane-dense output
# ----------------------------------------------------------------------------
def _pick_b_tile(B, T, target_rows=256):
    """Smallest batch tile whose row-block reaches ~target_rows (sublane aligned);
    otherwise run the whole batch in one grid step."""
    for d in range(1, B + 1):
        if B % d == 0 and (d * T) % 8 == 0 and d * T >= target_rows:
            return d
    return B


def _vmem_limit_bytes(operands, bt_blk, vp):
    param_bytes = sum(int(a.size) * a.dtype.itemsize for a in operands)
    work_bytes = bt_blk * C_PAD * 4 * 16 + bt_blk * vp * 4   # activations + one-hot
    est = 2 * param_bytes + 3 * work_bytes                   # double-buffer + headroom
    return int(min(max(est, 8 << 20), 48 << 20))             # stay under v7x 64 MiB


def cnn_predictor_forward(token_ids, gst_ids, packed, *, f0_pred="argmax", b_tile=None):
    """token_ids: (B, T) int; gst_ids: (B,) int; packed: pack_params(...) output."""
    B, T = token_ids.shape
    BT = B * T
    C = packed["channels"]
    n_bins = packed["n_bins"]
    K = packed["kernel_size"]
    n_layers = packed["n_layers"]
    V = packed["n_token_rows"]

    if b_tile is None:
        b_tile = _pick_b_tile(B, T)
    assert B % b_tile == 0
    bt_blk = b_tile * T
    assert bt_blk == BT or bt_blk % 8 == 0
    n_grid = B // b_tile

    tok_flat = token_ids.astype(jnp.int32).reshape(BT, 1)
    gst_flat = jnp.repeat(gst_ids.astype(jnp.int32), T).reshape(BT, 1)

    kernel = _make_fused_kernel(T, K, n_layers, C, n_bins, V, f0_pred)

    operands = (tok_flat, gst_flat,
                packed["emb_tab"], packed["conv_w"],
                packed["conv_b"], packed["ln_gamma"], packed["ln_beta"],
                packed["proj_w"], packed["proj_b"])

    def _const_spec(a):
        nd = a.ndim
        return pl.BlockSpec(a.shape, lambda i, _nd=nd: (0,) * _nd)

    in_specs = [
        pl.BlockSpec((bt_blk, 1), lambda i: (i, 0)),     # token ids (per batch tile)
        pl.BlockSpec((bt_blk, 1), lambda i: (i, 0)),     # gst ids   (per batch tile)
    ] + [_const_spec(a) for a in operands[2:]]           # weights: VMEM-resident

    out_specs = pl.BlockSpec((bt_blk, C_PAD), lambda i: (i, 0))

    out_pad = pl.pallas_call(
        kernel,
        out_shape=jax.ShapeDtypeStruct((BT, C_PAD), jnp.float32),
        grid=(n_grid,),
        in_specs=in_specs,
        out_specs=out_specs,
        compiler_params=pltpu.CompilerParams(
            dimension_semantics=("parallel",),
            vmem_limit_bytes=_vmem_limit_bytes(operands, bt_blk, packed["vocab_pad"])),
    )(*operands)

    # x.squeeze(-1) in the reference is a no-op for n_bins > 1
    return out_pad[:, :n_bins].reshape(B, T, n_bins)


# ----------------------------------------------------------------------------
# Parameter construction: "logical" (PyTorch-like) params + lane-padded packing
# ----------------------------------------------------------------------------
def init_logical_params(key, *, n_tokens, emb_dim, gst_dim, channels, kernel_size,
                        n_layers, n_bins):
    keys = jax.random.split(key, 3 + 2 * n_layers)
    ki = iter(keys)

    token_emb = 0.1 * jax.random.normal(next(ki), (n_tokens + 1, emb_dim), jnp.float32)
    token_emb = token_emb.at[n_tokens].set(0.0)                  # padding_idx row zeroed
    gst_emb = 0.1 * jax.random.normal(next(ki), (20, gst_dim), jnp.float32)

    feats = emb_dim + gst_dim
    conv_layers = []
    cin = feats
    for _ in range(n_layers):
        kw = jax.random.split(next(ki), 2)
        scale = 1.0 / jnp.sqrt(cin * kernel_size)
        w = scale * jax.random.normal(kw[0], (kernel_size, cin, channels), jnp.float32)
        b = scale * jax.random.normal(kw[1], (1, channels), jnp.float32)
        kln = jax.random.split(next(ki), 2)
        gamma = 1.0 + 0.01 * jax.random.normal(kln[0], (1, channels), jnp.float32)
        beta = 0.01 * jax.random.normal(kln[1], (1, channels), jnp.float32)
        conv_layers.append({"w": w, "b": b, "gamma": gamma, "beta": beta})
        cin = channels

    kp = jax.random.split(next(ki), 2)
    pscale = 1.0 / jnp.sqrt(channels)
    proj_w = pscale * jax.random.normal(kp[0], (channels, n_bins), jnp.float32)
    proj_b = pscale * jax.random.normal(kp[1], (1, n_bins), jnp.float32)

    return {"token_emb": token_emb, "gst_emb": gst_emb, "conv_layers": conv_layers,
            "proj_w": proj_w, "proj_b": proj_b}


def pack_params(p):
    """Zero-pad channels to 128 lanes, stack token+gst tables into one bf16 table,
    store matmul operands in bf16, per-layer scale/shift params in f32."""
    token_emb, gst_emb = p["token_emb"], p["gst_emb"]
    emb_dim, gst_dim = token_emb.shape[1], gst_emb.shape[1]
    V, NG = token_emb.shape[0], gst_emb.shape[0]
    K = p["conv_layers"][0]["w"].shape[0]
    C = p["conv_layers"][0]["w"].shape[2]
    n_layers = len(p["conv_layers"])
    n_bins = p["proj_w"].shape[1]
    assert emb_dim + gst_dim <= C_PAD and C <= C_PAD and n_bins <= C_PAD

    VP = ((V + NG + 127) // 128) * 128
    emb_tab = jnp.zeros((VP, C_PAD), jnp.float32)
    emb_tab = emb_tab.at[:V, :emb_dim].set(token_emb)                       # lanes [0:emb)
    emb_tab = emb_tab.at[V:V + NG, emb_dim:emb_dim + gst_dim].set(gst_emb)  # lanes [emb:emb+gst)

    ws, bs, gs, betas = [], [], [], []
    for layer in p["conv_layers"]:
        w = layer["w"]                                           # (K, Cin, C)
        cin = w.shape[1]
        wp = jnp.zeros((K, C_PAD, C_PAD), jnp.float32).at[:, :cin, :C].set(w)
        ws.append(wp)
        bs.append(jnp.zeros((1, C_PAD), jnp.float32).at[:, :C].set(layer["b"]))
        gs.append(jnp.zeros((1, C_PAD), jnp.float32).at[:, :C].set(layer["gamma"]))
        betas.append(jnp.zeros((1, C_PAD), jnp.float32).at[:, :C].set(layer["beta"]))
    conv_w = jnp.concatenate(ws, axis=0)                         # (n_layers*K, 128, 128)

    proj_w = jnp.zeros((C_PAD, C_PAD), jnp.float32).at[:C, :n_bins].set(p["proj_w"])
    proj_b = jnp.zeros((1, C_PAD), jnp.float32).at[:, :n_bins].set(p["proj_b"])

    return {"emb_tab": emb_tab.astype(jnp.bfloat16),
            "conv_w": conv_w.astype(jnp.bfloat16),
            "conv_b": jnp.stack(bs), "ln_gamma": jnp.stack(gs), "ln_beta": jnp.stack(betas),
            "proj_w": proj_w.astype(jnp.bfloat16), "proj_b": proj_b,
            "kernel_size": int(K), "channels": int(C), "n_bins": int(n_bins),
            "n_layers": int(n_layers), "n_token_rows": int(V), "n_gst_rows": int(NG),
            "vocab_pad": int(VP)}


# ----------------------------------------------------------------------------
# Pure-JAX reference (for numerical validation of the fused kernel)
# ----------------------------------------------------------------------------
def cnn_predictor_reference(token_ids, gst_ids, p, *, f0_pred="argmax"):
    hp = jax.lax.Precision.HIGHEST
    emb = jnp.take(p["token_emb"], token_ids, axis=0)            # (B, T, emb)
    B, T, _ = emb.shape
    gemb = jnp.take(p["gst_emb"], gst_ids, axis=0)               # (B, gst)
    gemb = jnp.broadcast_to(gemb[:, None, :], (B, T, gemb.shape[-1]))
    x = jnp.concatenate([emb, gemb], axis=-1)
    for i, layer in enumerate(p["conv_layers"]):
        w, b, gamma, beta = layer["w"], layer["b"], layer["gamma"], layer["beta"]
        K = w.shape[0]
        pad = (K - 1) // 2
        xp = jnp.pad(x, ((0, 0), (pad, pad), (0, 0)))
        h = b
        for j in range(K):
            h = h + jnp.einsum("btc,cd->btd", xp[:, j:j + T, :], w[j], precision=hp)
        h = jnp.maximum(h, 0.0)
        mean = jnp.mean(h, -1, keepdims=True)
        var = jnp.mean((h - mean) ** 2, -1, keepdims=True)
        y = (h - mean) * jax.lax.rsqrt(var + LN_EPS) * gamma + beta
        x = y + x if i != 0 else y
    logits = jnp.einsum("btc,cd->btd", x, p["proj_w"], precision=hp) + p["proj_b"]
    if f0_pred == "argmax":
        m = jnp.max(logits, -1, keepdims=True)
        e = jnp.exp(logits - m)
        return e / jnp.sum(e, -1, keepdims=True)
    elif f0_pred == "mean":
        return 1.0 / (1.0 + jnp.exp(-logits))
    raise NotImplementedError(f0_pred)


if __name__ == "__main__":
    # small config consistent with CnnPredictor(__init__)
    n_tokens = 50
    emb_dim = 24
    gst_dim = 8
    channels = 32
    kernel_size = 3
    n_layers = 3
    n_bins = 16
    B, T = 2, 16

    key = jax.random.PRNGKey(0)
    k_params, k_ids, k_gst = jax.random.split(key, 3)

    logical = init_logical_params(
        k_params, n_tokens=n_tokens, emb_dim=emb_dim, gst_dim=gst_dim,
        channels=channels, kernel_size=kernel_size, n_layers=n_layers, n_bins=n_bins)
    packed = pack_params(logical)

    token_ids = jax.random.randint(k_ids, (B, T), 0, n_tokens, dtype=jnp.int32)
    gst_ids = jax.random.randint(k_gst, (B,), 0, 20, dtype=jnp.int32)

    # b_tile=1 exercises the batch-tiled grid path (grid=(2,), 16-row blocks)
    probs = cnn_predictor_forward(token_ids, gst_ids, packed, f0_pred="argmax", b_tile=1)
    probs = jax.block_until_ready(probs)

    assert probs.shape == (B, T, n_bins)
    assert bool(jnp.all(jnp.isfinite(probs)))
    # softmax rows should sum to ~1 (normalization done in f32)
    assert bool(jnp.allclose(jnp.sum(probs, axis=-1), 1.0, atol=1e-3))
    # compare against the pure-JAX reference (tolerance covers bf16 MXU operands)
    ref = cnn_predictor_reference(token_ids, gst_ids, logical, f0_pred="argmax")
    err = float(jnp.max(jnp.abs(probs - ref)))
    assert err < 3e-2, f"mismatch vs reference: max abs err = {err}"

    print("KERNEL_OK")
</pallas_src>

<mosaic_0001>
module attributes {stable_mosaic.version = 11 : i64} {
  func.func @kernel(%arg0: i32, %arg1: memref<16x1xi32, #tpu.memory_space<vmem>>, %arg2: memref<16x1xi32, #tpu.memory_space<vmem>>, %arg3: memref<128x128xbf16, #tpu.memory_space<vmem>>, %arg4: memref<9x128x128xbf16, #tpu.memory_space<vmem>>, %arg5: memref<3x1x128xf32, #tpu.memory_space<vmem>>, %arg6: memref<3x1x128xf32, #tpu.memory_space<vmem>>, %arg7: memref<3x1x128xf32, #tpu.memory_space<vmem>>, %arg8: memref<128x128xbf16, #tpu.memory_space<vmem>>, %arg9: memref<1x128xf32, #tpu.memory_space<vmem>>, %arg10: memref<16x128xf32, #tpu.memory_space<vmem>>) attributes {dimension_semantics = [#tpu.dimension_semantics<parallel>], iteration_bounds = array<i64: 2>, scalar_prefetch = 0 : i64, scratch_operands = 0 : i64, tpu.core_type = #tpu.core_type<tc>, window_params = [{transform_indices = @transform_0, window_bounds = array<i64: 16, 1>}, {transform_indices = @transform_1, window_bounds = array<i64: 16, 1>}, {pipeline_mode = #tpu.pipeline_mode<synchronous>, transform_indices = @transform_2, window_bounds = array<i64: 128, 128>}, {pipeline_mode = #tpu.pipeline_mode<synchronous>, transform_indices = @transform_3, window_bounds = array<i64: 9, 128, 128>}, {pipeline_mode = #tpu.pipeline_mode<synchronous>, transform_indices = @transform_4, window_bounds = array<i64: 3, 1, 128>}, {pipeline_mode = #tpu.pipeline_mode<synchronous>, transform_indices = @transform_5, window_bounds = array<i64: 3, 1, 128>}, {pipeline_mode = #tpu.pipeline_mode<synchronous>, transform_indices = @transform_6, window_bounds = array<i64: 3, 1, 128>}, {pipeline_mode = #tpu.pipeline_mode<synchronous>, transform_indices = @transform_7, window_bounds = array<i64: 128, 128>}, {pipeline_mode = #tpu.pipeline_mode<synchronous>, transform_indices = @transform_8, window_bounds = array<i64: 1, 128>}, {transform_indices = @transform_9, window_bounds = array<i64: 16, 128>}]} {
    %c0 = arith.constant 0 : index
    %c0_0 = arith.constant 0 : index
    %0 = vector.load %arg1[%c0, %c0_0] : memref<16x1xi32, #tpu.memory_space<vmem>>, vector<16x1xi32>
    %c0_1 = arith.constant 0 : index
    %c0_2 = arith.constant 0 : index
    %1 = vector.load %arg2[%c0_1, %c0_2] : memref<16x1xi32, #tpu.memory_space<vmem>>, vector<16x1xi32>
    %2 = tpu.iota {dimensions = array<i32: 1>} : vector<16x128xi32>
    %3 = vector.broadcast %0 : vector<16x1xi32> to vector<16x128xi32>
    %4 = arith.cmpi eq, %2, %3 : vector<16x128xi32>
    %c51_i32 = arith.constant 51 : i32
    %5 = vector.broadcast %c51_i32 : i32 to vector<16x1xi32>
    %6 = arith.addi %1, %5 : vector<16x1xi32>
    %7 = vector.broadcast %6 : vector<16x1xi32> to vector<16x128xi32>
    %8 = arith.cmpi eq, %2, %7 : vector<16x128xi32>
    %9 = arith.ori %4, %8 : vector<16x128xi1>
    %cst = arith.constant 1.000000e+00 : f32
    %cst_3 = arith.constant 0.000000e+00 : f32
    %10 = vector.broadcast %cst : f32 to vector<16x128xf32>
    %11 = vector.broadcast %cst_3 : f32 to vector<16x128xf32>
    %12 = arith.select %9, %10, %11 : vector<16x128xi1>, vector<16x128xf32>
    %13 = arith.truncf %12 : vector<16x128xf32> to vector<16x128xbf16>
    %c0_4 = arith.constant 0 : index
    %c0_5 = arith.constant 0 : index
    %14 = vector.load %arg3[%c0_4, %c0_5] : memref<128x128xbf16, #tpu.memory_space<vmem>>, vector<128x128xbf16>
    %cst_6 = arith.constant dense<0.000000e+00> : vector<16x128xf32>
    %15 = tpu.matmul %13, %14, %cst_6 {dimension_numbers = #tpu.dot_dimension_numbers<[1], [0], [0], [1], [0, 0, 1, 1], [], []>} : vector<16x128xbf16>, vector<128x128xbf16>, vector<16x128xf32> -> vector<16x128xf32>
    %16 = tpu.iota {dimensions = array<i32: 0>} : vector<16x1xi32>
    %c16_i32 = arith.constant 16 : i32
    %c0_i32 = arith.constant 0 : i32
    %17 = arith.cmpi eq, %c16_i32, %c0_i32 : i32
    %c1_i32 = arith.constant 1 : i32
    %18 = arith.select %17, %c1_i32, %c16_i32 : i32
    %19 = vector.broadcast %18 : i32 to vector<16x1xi32>
    %20 = arith.remsi %16, %19 : vector<16x1xi32>
    %c0_i32_7 = arith.constant 0 : i32
    %21 = vector.broadcast %c0_i32_7 : i32 to vector<16x1xi32>
    %22 = arith.cmpi ne, %20, %21 : vector<16x1xi32>
    %c0_i32_8 = arith.constant 0 : i32
    %23 = vector.broadcast %c0_i32_8 : i32 to vector<16x1xi32>
    %24 = arith.cmpi slt, %20, %23 : vector<16x1xi32>
    %c0_i32_9 = arith.constant 0 : i32
    %25 = arith.cmpi slt, %18, %c0_i32_9 : i32
    %26 = vector.broadcast %25 : i1 to vector<16x1xi1>
    %27 = vector.broadcast %26 : vector<16x1xi1> to vector<16x1xi1>
    %28 = arith.xori %24, %27 : vector<16x1xi1>
    %29 = arith.andi %28, %22 : vector<16x1xi1>
    %30 = vector.broadcast %18 : i32 to vector<16x1xi32>
    %31 = arith.addi %20, %30 : vector<16x1xi32>
    %32 = arith.select %29, %31, %20 : vector<16x1xi1>, vector<16x1xi32>
    %33 = tpu.iota {dimensions = array<i32: 1>} : vector<16x128xi32>
    %c32_i32 = arith.constant 32 : i32
    %34 = vector.broadcast %c32_i32 : i32 to vector<16x128xi32>
    %35 = arith.cmpi slt, %33, %34 : vector<16x128xi32>
    %c-1_i32 = arith.constant -1 : i32
    %36 = vector.broadcast %c-1_i32 : i32 to vector<16x1xi32>
    %37 = arith.addi %32, %36 : vector<16x1xi32>
    %c0_i32_10 = arith.constant 0 : i32
    %38 = vector.broadcast %c0_i32_10 : i32 to vector<16x1xi32>
    %39 = arith.cmpi sge, %37, %38 : vector<16x1xi32>
    %c-1_i32_11 = arith.constant -1 : i32
    %40 = vector.broadcast %c-1_i32_11 : i32 to vector<16x1xi32>
    %41 = arith.addi %32, %40 : vector<16x1xi32>
    %c16_i32_12 = arith.constant 16 : i32
    %42 = vector.broadcast %c16_i32_12 : i32 to vector<16x1xi32>
    %43 = arith.cmpi slt, %41, %42 : vector<16x1xi32>
    %44 = arith.andi %39, %43 : vector<16x1xi1>
    %45 = vector.shape_cast %44 : vector<16x1xi1> to vector<16x1xi1>
    %46 = vector.broadcast %45 : vector<16x1xi1> to vector<16x128xi1>
    %c1_i32_13 = arith.constant 1 : i32
    %47 = vector.broadcast %c1_i32_13 : i32 to vector<16x1xi32>
    %48 = arith.addi %32, %47 : vector<16x1xi32>
    %c0_i32_14 = arith.constant 0 : i32
    %49 = vector.broadcast %c0_i32_14 : i32 to vector<16x1xi32>
    %50 = arith.cmpi sge, %48, %49 : vector<16x1xi32>
    %c1_i32_15 = arith.constant 1 : i32
    %51 = vector.broadcast %c1_i32_15 : i32 to vector<16x1xi32>
    %52 = arith.addi %32, %51 : vector<16x1xi32>
    %c16_i32_16 = arith.constant 16 : i32
    %53 = vector.broadcast %c16_i32_16 : i32 to vector<16x1xi32>
    %54 = arith.cmpi slt, %52, %53 : vector<16x1xi32>
    %55 = arith.andi %50, %54 : vector<16x1xi1>
    %56 = vector.shape_cast %55 : vector<16x1xi1> to vector<16x1xi1>
    %57 = vector.broadcast %56 : vector<16x1xi1> to vector<16x128xi1>
    %58 = arith.truncf %15 : vector<16x128xf32> to vector<16x128xbf16>
    %c1_i32_17 = arith.constant 1 : i32
    %59 = tpu.dynamic_rotate %15 by %c1_i32_17 dim 0 : vector<16x128xf32>, i32 -> vector<16x128xf32>
    %cst_18 = arith.constant 0.000000e+00 : f32
    %60 = vector.broadcast %cst_18 : f32 to vector<16x128xf32>
    %61 = arith.select %46, %59, %60 : vector<16x128xi1>, vector<16x128xf32>
    %62 = arith.truncf %61 : vector<16x128xf32> to vector<16x128xbf16>
    %c0_19 = arith.constant 0 : index
    %c0_20 = arith.constant 0 : index
    %c0_21 = arith.constant 0 : index
    %63 = vector.load %arg4[%c0_19, %c0_20, %c0_21] : memref<9x128x128xbf16, #tpu.memory_space<vmem>>, vector<1x128x128xbf16>
    %64 = vector.shape_cast %63 : vector<1x128x128xbf16> to vector<128x128xbf16>
    %cst_22 = arith.constant dense<0.000000e+00> : vector<16x128xf32>
    %65 = tpu.matmul %62, %64, %cst_22 {dimension_numbers = #tpu.dot_dimension_numbers<[1], [0], [0], [1], [0, 0, 1, 1], [], []>} : vector<16x128xbf16>, vector<128x128xbf16>, vector<16x128xf32> -> vector<16x128xf32>
    %c1 = arith.constant 1 : index
    %c0_23 = arith.constant 0 : index
    %c0_24 = arith.constant 0 : index
    %66 = vector.load %arg4[%c1, %c0_23, %c0_24] : memref<9x128x128xbf16, #tpu.memory_space<vmem>>, vector<1x128x128xbf16>
    %67 = vector.shape_cast %66 : vector<1x128x128xbf16> to vector<128x128xbf16>
    %cst_25 = arith.constant dense<0.000000e+00> : vector<16x128xf32>
    %68 = tpu.matmul %58, %67, %cst_25 {dimension_numbers = #tpu.dot_dimension_numbers<[1], [0], [0], [1], [0, 0, 1, 1], [], []>} : vector<16x128xbf16>, vector<128x128xbf16>, vector<16x128xf32> -> vector<16x128xf32>
    %69 = arith.addf %65, %68 : vector<16x128xf32>
    %c15_i32 = arith.constant 15 : i32
    %70 = tpu.dynamic_rotate %15 by %c15_i32 dim 0 : vector<16x128xf32>, i32 -> vector<16x128xf32>
    %cst_26 = arith.constant 0.000000e+00 : f32
    %71 = vector.broadcast %cst_26 : f32 to vector<16x128xf32>
    %72 = arith.select %57, %70, %71 : vector<16x128xi1>, vector<16x128xf32>
    %73 = arith.truncf %72 : vector<16x128xf32> to vector<16x128xbf16>
    %c2 = arith.constant 2 : index
    %c0_27 = arith.constant 0 : index
    %c0_28 = arith.constant 0 : index
    %74 = vector.load %arg4[%c2, %c0_27, %c0_28] : memref<9x128x128xbf16, #tpu.memory_space<vmem>>, vector<1x128x128xbf16>
    %75 = vector.shape_cast %74 : vector<1x128x128xbf16> to vector<128x128xbf16>
    %cst_29 = arith.constant dense<0.000000e+00> : vector<16x128xf32>
    %76 = tpu.matmul %73, %75, %cst_29 {dimension_numbers = #tpu.dot_dimension_numbers<[1], [0], [0], [1], [0, 0, 1, 1], [], []>} : vector<16x128xbf16>, vector<128x128xbf16>, vector<16x128xf32> -> vector<16x128xf32>
    %77 = arith.addf %69, %76 : vector<16x128xf32>
    %c0_30 = arith.constant 0 : index
    %c0_31 = arith.constant 0 : index
    %c0_32 = arith.constant 0 : index
    %78 = vector.load %arg5[%c0_30, %c0_31, %c0_32] : memref<3x1x128xf32, #tpu.memory_space<vmem>>, vector<1x1x128xf32>
    %79 = vector.shape_cast %78 : vector<1x1x128xf32> to vector<1x128xf32>
    %80 = vector.broadcast %79 : vector<1x128xf32> to vector<16x128xf32>
    %81 = arith.addf %77, %80 : vector<16x128xf32>
    %cst_33 = arith.constant 0.000000e+00 : f32
    %82 = vector.broadcast %cst_33 : f32 to vector<16x128xf32>
    %83 = arith.maximumf %81, %82 : vector<16x128xf32>
    %cst_34 = arith.constant dense<0.000000e+00> : vector<16xf32>
    %84 = vector.multi_reduction <add>, %83, %cst_34 [1] : vector<16x128xf32> to vector<16xf32>
    %85 = vector.shape_cast %84 : vector<16xf32> to vector<16x1xf32>
    %cst_35 = arith.constant 3.125000e-02 : f32
    %86 = vector.broadcast %cst_35 : f32 to vector<16x1xf32>
    %87 = arith.mulf %85, %86 : vector<16x1xf32>
    %88 = vector.broadcast %87 : vector<16x1xf32> to vector<16x128xf32>
    %89 = arith.subf %83, %88 : vector<16x128xf32>
    %cst_36 = arith.constant 0.000000e+00 : f32
    %90 = vector.broadcast %cst_36 : f32 to vector<16x128xf32>
    %91 = arith.select %35, %89, %90 : vector<16x128xi1>, vector<16x128xf32>
    %92 = arith.mulf %91, %91 : vector<16x128xf32>
    %cst_37 = arith.constant dense<0.000000e+00> : vector<16xf32>
    %93 = vector.multi_reduction <add>, %92, %cst_37 [1] : vector<16x128xf32> to vector<16xf32>
    %94 = vector.shape_cast %93 : vector<16xf32> to vector<16x1xf32>
    %cst_38 = arith.constant 3.125000e-02 : f32
    %95 = vector.broadcast %cst_38 : f32 to vector<16x1xf32>
    %96 = arith.mulf %94, %95 : vector<16x1xf32>
    %cst_39 = arith.constant 9.99999974E-6 : f32
    %97 = vector.broadcast %cst_39 : f32 to vector<16x1xf32>
    %98 = arith.addf %96, %97 : vector<16x1xf32>
    %99 = math.rsqrt %98 : vector<16x1xf32>
    %100 = vector.broadcast %99 : vector<16x1xf32> to vector<16x128xf32>
    %101 = arith.mulf %91, %100 : vector<16x128xf32>
    %c0_40 = arith.constant 0 : index
    %c0_41 = arith.constant 0 : index
    %c0_42 = arith.constant 0 : index
    %102 = vector.load %arg6[%c0_40, %c0_41, %c0_42] : memref<3x1x128xf32, #tpu.memory_space<vmem>>, vector<1x1x128xf32>
    %103 = vector.shape_cast %102 : vector<1x1x128xf32> to vector<1x128xf32>
    %104 = vector.broadcast %103 : vector<1x128xf32> to vector<16x128xf32>
    %105 = arith.mulf %101, %104 : vector<16x128xf32>
    %c0_43 = arith.constant 0 : index
    %c0_44 = arith.constant 0 : index
    %c0_45 = arith.constant 0 : index
    %106 = vector.load %arg7[%c0_43, %c0_44, %c0_45] : memref<3x1x128xf32, #tpu.memory_space<vmem>>, vector<1x1x128xf32>
    %107 = vector.shape_cast %106 : vector<1x1x128xf32> to vector<1x128xf32>
    %108 = vector.broadcast %107 : vector<1x128xf32> to vector<16x128xf32>
    %109 = arith.addf %105, %108 : vector<16x128xf32>
    %110 = arith.truncf %109 : vector<16x128xf32> to vector<16x128xbf16>
    %c1_i32_46 = arith.constant 1 : i32
    %111 = tpu.dynamic_rotate %109 by %c1_i32_46 dim 0 : vector<16x128xf32>, i32 -> vector<16x128xf32>
    %cst_47 = arith.constant 0.000000e+00 : f32
    %112 = vector.broadcast %cst_47 : f32 to vector<16x128xf32>
    %113 = arith.select %46, %111, %112 : vector<16x128xi1>, vector<16x128xf32>
    %114 = arith.truncf %113 : vector<16x128xf32> to vector<16x128xbf16>
    %c3 = arith.constant 3 : index
    %c0_48 = arith.constant 0 : index
    %c0_49 = arith.constant 0 : index
    %115 = vector.load %arg4[%c3, %c0_48, %c0_49] : memref<9x128x128xbf16, #tpu.memory_space<vmem>>, vector<1x128x128xbf16>
    %116 = vector.shape_cast %115 : vector<1x128x128xbf16> to vector<128x128xbf16>
    %cst_50 = arith.constant dense<0.000000e+00> : vector<16x128xf32>
    %117 = tpu.matmul %114, %116, %cst_50 {dimension_numbers = #tpu.dot_dimension_numbers<[1], [0], [0], [1], [0, 0, 1, 1], [], []>} : vector<16x128xbf16>, vector<128x128xbf16>, vector<16x128xf32> -> vector<16x128xf32>
    %c4 = arith.constant 4 : index
    %c0_51 = arith.constant 0 : index
    %c0_52 = arith.constant 0 : index
    %118 = vector.load %arg4[%c4, %c0_51, %c0_52] : memref<9x128x128xbf16, #tpu.memory_space<vmem>>, vector<1x128x128xbf16>
    %119 = vector.shape_cast %118 : vector<1x128x128xbf16> to vector<128x128xbf16>
    %cst_53 = arith.constant dense<0.000000e+00> : vector<16x128xf32>
    %120 = tpu.matmul %110, %119, %cst_53 {dimension_numbers = #tpu.dot_dimension_numbers<[1], [0], [0], [1], [0, 0, 1, 1], [], []>} : vector<16x128xbf16>, vector<128x128xbf16>, vector<16x128xf32> -> vector<16x128xf32>
    %121 = arith.addf %117, %120 : vector<16x128xf32>
    %c15_i32_54 = arith.constant 15 : i32
    %122 = tpu.dynamic_rotate %109 by %c15_i32_54 dim 0 : vector<16x128xf32>, i32 -> vector<16x128xf32>
    %cst_55 = arith.constant 0.000000e+00 : f32
    %123 = vector.broadcast %cst_55 : f32 to vector<16x128xf32>
    %124 = arith.select %57, %122, %123 : vector<16x128xi1>, vector<16x128xf32>
    %125 = arith.truncf %124 : vector<16x128xf32> to vector<16x128xbf16>
    %c5 = arith.constant 5 : index
    %c0_56 = arith.constant 0 : index
    %c0_57 = arith.constant 0 : index
    %126 = vector.load %arg4[%c5, %c0_56, %c0_57] : memref<9x128x128xbf16, #tpu.memory_space<vmem>>, vector<1x128x128xbf16>
    %127 = vector.shape_cast %126 : vector<1x128x128xbf16> to vector<128x128xbf16>
    %cst_58 = arith.constant dense<0.000000e+00> : vector<16x128xf32>
    %128 = tpu.matmul %125, %127, %cst_58 {dimension_numbers = #tpu.dot_dimension_numbers<[1], [0], [0], [1], [0, 0, 1, 1], [], []>} : vector<16x128xbf16>, vector<128x128xbf16>, vector<16x128xf32> -> vector<16x128xf32>
    %129 = arith.addf %121, %128 : vector<16x128xf32>
    %c1_59 = arith.constant 1 : index
    %c0_60 = arith.constant 0 : index
    %c0_61 = arith.constant 0 : index
    %130 = vector.load %arg5[%c1_59, %c0_60, %c0_61] : memref<3x1x128xf32, #tpu.memory_space<vmem>>, vector<1x1x128xf32>
    %131 = vector.shape_cast %130 : vector<1x1x128xf32> to vector<1x128xf32>
    %132 = vector.broadcast %131 : vector<1x128xf32> to vector<16x128xf32>
    %133 = arith.addf %129, %132 : vector<16x128xf32>
    %cst_62 = arith.constant 0.000000e+00 : f32
    %134 = vector.broadcast %cst_62 : f32 to vector<16x128xf32>
    %135 = arith.maximumf %133, %134 : vector<16x128xf32>
    %cst_63 = arith.constant dense<0.000000e+00> : vector<16xf32>
    %136 = vector.multi_reduction <add>, %135, %cst_63 [1] : vector<16x128xf32> to vector<16xf32>
    %137 = vector.shape_cast %136 : vector<16xf32> to vector<16x1xf32>
    %cst_64 = arith.constant 3.125000e-02 : f32
    %138 = vector.broadcast %cst_64 : f32 to vector<16x1xf32>
    %139 = arith.mulf %137, %138 : vector<16x1xf32>
    %140 = vector.broadcast %139 : vector<16x1xf32> to vector<16x128xf32>
    %141 = arith.subf %135, %140 : vector<16x128xf32>
    %cst_65 = arith.constant 0.000000e+00 : f32
    %142 = vector.broadcast %cst_65 : f32 to vector<16x128xf32>
    %143 = arith.select %35, %141, %142 : vector<16x128xi1>, vector<16x128xf32>
    %144 = arith.mulf %143, %143 : vector<16x128xf32>
    %cst_66 = arith.constant dense<0.000000e+00> : vector<16xf32>
    %145 = vector.multi_reduction <add>, %144, %cst_66 [1] : vector<16x128xf32> to vector<16xf32>
    %146 = vector.shape_cast %145 : vector<16xf32> to vector<16x1xf32>
    %cst_67 = arith.constant 3.125000e-02 : f32
    %147 = vector.broadcast %cst_67 : f32 to vector<16x1xf32>
    %148 = arith.mulf %146, %147 : vector<16x1xf32>
    %cst_68 = arith.constant 9.99999974E-6 : f32
    %149 = vector.broadcast %cst_68 : f32 to vector<16x1xf32>
    %150 = arith.addf %148, %149 : vector<16x1xf32>
    %151 = math.rsqrt %150 : vector<16x1xf32>
    %152 = vector.broadcast %151 : vector<16x1xf32> to vector<16x128xf32>
    %153 = arith.mulf %143, %152 : vector<16x128xf32>
    %c1_69 = arith.constant 1 : index
    %c0_70 = arith.constant 0 : index
    %c0_71 = arith.constant 0 : index
    %154 = vector.load %arg6[%c1_69, %c0_70, %c0_71] : memref<3x1x128xf32, #tpu.memory_space<vmem>>, vector<1x1x128xf32>
    %155 = vector.shape_cast %154 : vector<1x1x128xf32> to vector<1x128xf32>
    %156 = vector.broadcast %155 : vector<1x128xf32> to vector<16x128xf32>
    %157 = arith.mulf %153, %156 : vector<16x128xf32>
    %c1_72 = arith.constant 1 : index
    %c0_73 = arith.constant 0 : index
    %c0_74 = arith.constant 0 : index
    %158 = vector.load %arg7[%c1_72, %c0_73, %c0_74] : memref<3x1x128xf32, #tpu.memory_space<vmem>>, vector<1x1x128xf32>
    %159 = vector.shape_cast %158 : vector<1x1x128xf32> to vector<1x128xf32>
    %160 = vector.broadcast %159 : vector<1x128xf32> to vector<16x128xf32>
    %161 = arith.addf %157, %160 : vector<16x128xf32>
    %162 = arith.addf %161, %109 : vector<16x128xf32>
    %163 = arith.truncf %162 : vector<16x128xf32> to vector<16x128xbf16>
    %c1_i32_75 = arith.constant 1 : i32
    %164 = tpu.dynamic_rotate %162 by %c1_i32_75 dim 0 : vector<16x128xf32>, i32 -> vector<16x128xf32>
    %cst_76 = arith.constant 0.000000e+00 : f32
    %165 = vector.broadcast %cst_76 : f32 to vector<16x128xf32>
    %166 = arith.select %46, %164, %165 : vector<16x128xi1>, vector<16x128xf32>
    %167 = arith.truncf %166 : vector<16x128xf32> to vector<16x128xbf16>
    %c6 = arith.constant 6 : index
    %c0_77 = arith.constant 0 : index
    %c0_78 = arith.constant 0 : index
    %168 = vector.load %arg4[%c6, %c0_77, %c0_78] : memref<9x128x128xbf16, #tpu.memory_space<vmem>>, vector<1x128x128xbf16>
    %169 = vector.shape_cast %168 : vector<1x128x128xbf16> to vector<128x128xbf16>
    %cst_79 = arith.constant dense<0.000000e+00> : vector<16x128xf32>
    %170 = tpu.matmul %167, %169, %cst_79 {dimension_numbers = #tpu.dot_dimension_numbers<[1], [0], [0], [1], [0, 0, 1, 1], [], []>} : vector<16x128xbf16>, vector<128x128xbf16>, vector<16x128xf32> -> vector<16x128xf32>
    %c7 = arith.constant 7 : index
    %c0_80 = arith.constant 0 : index
    %c0_81 = arith.constant 0 : index
    %171 = vector.load %arg4[%c7, %c0_80, %c0_81] : memref<9x128x128xbf16, #tpu.memory_space<vmem>>, vector<1x128x128xbf16>
    %172 = vector.shape_cast %171 : vector<1x128x128xbf16> to vector<128x128xbf16>
    %cst_82 = arith.constant dense<0.000000e+00> : vector<16x128xf32>
    %173 = tpu.matmul %163, %172, %cst_82 {dimension_numbers = #tpu.dot_dimension_numbers<[1], [0], [0], [1], [0, 0, 1, 1], [], []>} : vector<16x128xbf16>, vector<128x128xbf16>, vector<16x128xf32> -> vector<16x128xf32>
    %174 = arith.addf %170, %173 : vector<16x128xf32>
    %c15_i32_83 = arith.constant 15 : i32
    %175 = tpu.dynamic_rotate %162 by %c15_i32_83 dim 0 : vector<16x128xf32>, i32 -> vector<16x128xf32>
    %cst_84 = arith.constant 0.000000e+00 : f32
    %176 = vector.broadcast %cst_84 : f32 to vector<16x128xf32>
    %177 = arith.select %57, %175, %176 : vector<16x128xi1>, vector<16x128xf32>
    %178 = arith.truncf %177 : vector<16x128xf32> to vector<16x128xbf16>
    %c8 = arith.constant 8 : index
    %c0_85 = arith.constant 0 : index
    %c0_86 = arith.constant 0 : index
    %179 = vector.load %arg4[%c8, %c0_85, %c0_86] : memref<9x128x128xbf16, #tpu.memory_space<vmem>>, vector<1x128x128xbf16>
    %180 = vector.shape_cast %179 : vector<1x128x128xbf16> to vector<128x128xbf16>
    %cst_87 = arith.constant dense<0.000000e+00> : vector<16x128xf32>
    %181 = tpu.matmul %178, %180, %cst_87 {dimension_numbers = #tpu.dot_dimension_numbers<[1], [0], [0], [1], [0, 0, 1, 1], [], []>} : vector<16x128xbf16>, vector<128x128xbf16>, vector<16x128xf32> -> vector<16x128xf32>
    %182 = arith.addf %174, %181 : vector<16x128xf32>
    %c2_88 = arith.constant 2 : index
    %c0_89 = arith.constant 0 : index
    %c0_90 = arith.constant 0 : index
    %183 = vector.load %arg5[%c2_88, %c0_89, %c0_90] : memref<3x1x128xf32, #tpu.memory_space<vmem>>, vector<1x1x128xf32>
    %184 = vector.shape_cast %183 : vector<1x1x128xf32> to vector<1x128xf32>
    %185 = vector.broadcast %184 : vector<1x128xf32> to vector<16x128xf32>
    %186 = arith.addf %182, %185 : vector<16x128xf32>
    %cst_91 = arith.constant 0.000000e+00 : f32
    %187 = vector.broadcast %cst_91 : f32 to vector<16x128xf32>
    %188 = arith.maximumf %186, %187 : vector<16x128xf32>
    %cst_92 = arith.constant dense<0.000000e+00> : vector<16xf32>
    %189 = vector.multi_reduction <add>, %188, %cst_92 [1] : vector<16x128xf32> to vector<16xf32>
    %190 = vector.shape_cast %189 : vector<16xf32> to vector<16x1xf32>
    %cst_93 = arith.constant 3.125000e-02 : f32
    %191 = vector.broadcast %cst_93 : f32 to vector<16x1xf32>
    %192 = arith.mulf %190, %191 : vector<16x1xf32>
    %193 = vector.broadcast %192 : vector<16x1xf32> to vector<16x128xf32>
    %194 = arith.subf %188, %193 : vector<16x128xf32>
    %cst_94 = arith.constant 0.000000e+00 : f32
    %195 = vector.broadcast %cst_94 : f32 to vector<16x128xf32>
    %196 = arith.select %35, %194, %195 : vector<16x128xi1>, vector<16x128xf32>
    %197 = arith.mulf %196, %196 : vector<16x128xf32>
    %cst_95 = arith.constant dense<0.000000e+00> : vector<16xf32>
    %198 = vector.multi_reduction <add>, %197, %cst_95 [1] : vector<16x128xf32> to vector<16xf32>
    %199 = vector.shape_cast %198 : vector<16xf32> to vector<16x1xf32>
    %cst_96 = arith.constant 3.125000e-02 : f32
    %200 = vector.broadcast %cst_96 : f32 to vector<16x1xf32>
    %201 = arith.mulf %199, %200 : vector<16x1xf32>
    %cst_97 = arith.constant 9.99999974E-6 : f32
    %202 = vector.broadcast %cst_97 : f32 to vector<16x1xf32>
    %203 = arith.addf %201, %202 : vector<16x1xf32>
    %204 = math.rsqrt %203 : vector<16x1xf32>
    %205 = vector.broadcast %204 : vector<16x1xf32> to vector<16x128xf32>
    %206 = arith.mulf %196, %205 : vector<16x128xf32>
    %c2_98 = arith.constant 2 : index
    %c0_99 = arith.constant 0 : index
    %c0_100 = arith.constant 0 : index
    %207 = vector.load %arg6[%c2_98, %c0_99, %c0_100] : memref<3x1x128xf32, #tpu.memory_space<vmem>>, vector<1x1x128xf32>
    %208 = vector.shape_cast %207 : vector<1x1x128xf32> to vector<1x128xf32>
    %209 = vector.broadcast %208 : vector<1x128xf32> to vector<16x128xf32>
    %210 = arith.mulf %206, %209 : vector<16x128xf32>
    %c2_101 = arith.constant 2 : index
    %c0_102 = arith.constant 0 : index
    %c0_103 = arith.constant 0 : index
    %211 = vector.load %arg7[%c2_101, %c0_102, %c0_103] : memref<3x1x128xf32, #tpu.memory_space<vmem>>, vector<1x1x128xf32>
    %212 = vector.shape_cast %211 : vector<1x1x128xf32> to vector<1x128xf32>
    %213 = vector.broadcast %212 : vector<1x128xf32> to vector<16x128xf32>
    %214 = arith.addf %210, %213 : vector<16x128xf32>
    %215 = arith.addf %214, %162 : vector<16x128xf32>
    %216 = arith.truncf %215 : vector<16x128xf32> to vector<16x128xbf16>
    %c0_104 = arith.constant 0 : index
    %c0_105 = arith.constant 0 : index
    %217 = vector.load %arg8[%c0_104, %c0_105] : memref<128x128xbf16, #tpu.memory_space<vmem>>, vector<128x128xbf16>
    %cst_106 = arith.constant dense<0.000000e+00> : vector<16x128xf32>
    %218 = tpu.matmul %216, %217, %cst_106 {dimension_numbers = #tpu.dot_dimension_numbers<[1], [0], [0], [1], [0, 0, 1, 1], [], []>} : vector<16x128xbf16>, vector<128x128xbf16>, vector<16x128xf32> -> vector<16x128xf32>
    %c0_107 = arith.constant 0 : index
    %c0_108 = arith.constant 0 : index
    %219 = vector.load %arg9[%c0_107, %c0_108] : memref<1x128xf32, #tpu.memory_space<vmem>>, vector<1x128xf32>
    %220 = vector.broadcast %219 : vector<1x128xf32> to vector<16x128xf32>
    %221 = arith.addf %218, %220 : vector<16x128xf32>
    %c16_i32_109 = arith.constant 16 : i32
    %222 = vector.broadcast %c16_i32_109 : i32 to vector<16x128xi32>
    %223 = arith.cmpi slt, %33, %222 : vector<16x128xi32>
    %cst_110 = arith.constant -1.000000e+30 : f32
    %224 = vector.broadcast %cst_110 : f32 to vector<16x128xf32>
    %225 = arith.select %223, %221, %224 : vector<16x128xi1>, vector<16x128xf32>
    %cst_111 = arith.constant dense<0xFF800000> : vector<16xf32>
    %226 = vector.multi_reduction <maximumf>, %225, %cst_111 [1] : vector<16x128xf32> to vector<16xf32>
    %227 = vector.shape_cast %226 : vector<16xf32> to vector<16x1xf32>
    %228 = vector.broadcast %227 : vector<16x1xf32> to vector<16x128xf32>
    %229 = arith.subf %225, %228 : vector<16x128xf32>
    %230 = math.exp %229 : vector<16x128xf32>
    %cst_112 = arith.constant dense<0.000000e+00> : vector<16xf32>
    %231 = vector.multi_reduction <add>, %230, %cst_112 [1] : vector<16x128xf32> to vector<16xf32>
    %232 = vector.shape_cast %231 : vector<16xf32> to vector<16x1xf32>
    %233 = tpu.reciprocal %232 : vector<16x1xf32> -> vector<16x1xf32>
    %234 = vector.broadcast %233 : vector<16x1xf32> to vector<16x128xf32>
    %235 = arith.mulf %230, %234 : vector<16x128xf32>
    %c0_113 = arith.constant 0 : index
    %c0_114 = arith.constant 0 : index
    %236 = vector.load %arg10[%c0_113, %c0_114] : memref<16x128xf32, #tpu.memory_space<vmem>>, vector<16x128xf32>
    tpu.vector_store %arg10[%c0_113, %c0_114], %235 {strides = array<i32>} : memref<16x128xf32, #tpu.memory_space<vmem>>, vector<16x128xf32>,
    return
  }
  func.func @transform_0(%arg0: i32) -> (i32, i32) {
    %c0_i32 = arith.constant 0 : i32
    %c0_i32_0 = arith.constant 0 : i32
    return %arg0, %c0_i32 : i32, i32
  }
  func.func @transform_1(%arg0: i32) -> (i32, i32) {
    %c0_i32 = arith.constant 0 : i32
    %c0_i32_0 = arith.constant 0 : i32
    return %arg0, %c0_i32 : i32, i32
  }
  func.func @transform_2(%arg0: i32) -> (i32, i32) {
    %c0_i32 = arith.constant 0 : i32
    %c0_i32_0 = arith.constant 0 : i32
    %c0_i32_1 = arith.constant 0 : i32
    return %c0_i32, %c0_i32_0 : i32, i32
  }
  func.func @transform_3(%arg0: i32) -> (i32, i32, i32) {
    %c0_i32 = arith.constant 0 : i32
    %c0_i32_0 = arith.constant 0 : i32
    %c0_i32_1 = arith.constant 0 : i32
    %c0_i32_2 = arith.constant 0 : i32
    return %c0_i32, %c0_i32_0, %c0_i32_1 : i32, i32, i32
  }
  func.func @transform_4(%arg0: i32) -> (i32, i32, i32) {
    %c0_i32 = arith.constant 0 : i32
    %c0_i32_0 = arith.constant 0 : i32
    %c0_i32_1 = arith.constant 0 : i32
    %c0_i32_2 = arith.constant 0 : i32
    return %c0_i32, %c0_i32_0, %c0_i32_1 : i32, i32, i32
  }
  func.func @transform_5(%arg0: i32) -> (i32, i32, i32) {
    %c0_i32 = arith.constant 0 : i32
    %c0_i32_0 = arith.constant 0 : i32
    %c0_i32_1 = arith.constant 0 : i32
    %c0_i32_2 = arith.constant 0 : i32
    return %c0_i32, %c0_i32_0, %c0_i32_1 : i32, i32, i32
  }
  func.func @transform_6(%arg0: i32) -> (i32, i32, i32) {
    %c0_i32 = arith.constant 0 : i32
    %c0_i32_0 = arith.constant 0 : i32
    %c0_i32_1 = arith.constant 0 : i32
    %c0_i32_2 = arith.constant 0 : i32
    return %c0_i32, %c0_i32_0, %c0_i32_1 : i32, i32, i32
  }
  func.func @transform_7(%arg0: i32) -> (i32, i32) {
    %c0_i32 = arith.constant 0 : i32
    %c0_i32_0 = arith.constant 0 : i32
    %c0_i32_1 = arith.constant 0 : i32
    return %c0_i32, %c0_i32_0 : i32, i32
  }
  func.func @transform_8(%arg0: i32) -> (i32, i32) {
    %c0_i32 = arith.constant 0 : i32
    %c0_i32_0 = arith.constant 0 : i32
    %c0_i32_1 = arith.constant 0 : i32
    return %c0_i32, %c0_i32_0 : i32, i32
  }
  func.func @transform_9(%arg0: i32) -> (i32, i32) {
    %c0_i32 = arith.constant 0 : i32
    %c0_i32_0 = arith.constant 0 : i32
    return %arg0, %c0_i32 : i32, i32
  }
}

</mosaic_0001>

<bundles_post_ra>
// kernel: tpu_custom_call.1
= control target key start
LH: loop header
LB: loop body
LE: loop exit
PB: predicated region body
PF: predicated region fallthrough
CT: control target
= control target key end

     0   :  { %14 = vsyncpa [#allocation3], 0  ;;  %s3262_s0 = inlined_call_operand.vmem [shape: s32[32,1], index: 0, kind: input, shape index: {}]   ;;  %s3263_s1 = inlined_call_operand.vmem [shape: s32[32,1], index: 1, kind: input, shape index: {}]   ;;  %s3264_s2 = inlined_call_operand.vmem [shape: bf16[128,128], index: 2, kind: input, shape index: {}]   ;;  %s3265_s3 = inlined_call_operand.hbm [shape: bf16[9,128,128], index: 3, kind: input, shape index: {}]   ;;  %s3266_s4 = inlined_call_operand.vmem [shape: f32[3,1,128], index: 4, kind: input, shape index: {}]   ;;  %s3267_s5 = inlined_call_operand.vmem [shape: f32[3,1,128], index: 5, kind: input, shape index: {}]   ;;  %s3268_s6 = inlined_call_operand.vmem [shape: f32[3,1,128], index: 6, kind: input, shape index: {}]   ;;  %s3269_s7 = inlined_call_operand.hbm [shape: bf16[128,128], index: 7, kind: input, shape index: {}]   ;;  %s3270_s8 = inlined_call_operand.vmem [shape: f32[1,128], index: 8, kind: input, shape index: {}]   ;;  %s3271_s9 = inlined_call_operand.hbm [shape: f32[32,128], index: 9, kind: output, shape index: {}]  }
   0x1   :  { %15 = vsyncpa [#allocation6], 0 }
   0x2   :  { %16 = vsyncpa [#allocation4], 0 }
   0x3   :  { %18 = vsyncpa [#allocation4 + $0x1], 0  ;;  %s2825_s30 = smov 0   ;;  %s2827_s10 = smov 0  }
   0x4   :  { %s2829_s11 = smov 0   ;;  %s2831_s12 = smov 0  }
   0x5 LB: > { %3278 = sst [smem:[#allocation11_spill]] %s2757_s11  ;;  %s2846_s13 = sadd.s32 4294967295, %s2761_s12   ;;  %s2761_s12 = sphi %s2831_s12, %s3296_s12   ;;  %s2757_s11 = sphi %s2829_s11, %s3298_s11   ;;  %s2753_s10 = sphi %s2827_s10, %s3300_s10   ;;  %s2749_s30 = sphi %s2825_s30, %s3299_s30  }
   0x6   : > { %s1994_s14 = sadd.s32 4294967294, %s2761_s12   ;;  %s2850_s15 = sadd.s32 1, %s2761_s12  }
   0x7   : > { %3279 = sst [smem:[#allocation12_spill]] %s2850_s15  ;;  %s230_s16 = sadd.s32 1, %s2757_s11 }
   0x8   : > { %s227_s17 = ssub.s32 %s2761_s12, %s2850_s15  ;;  %p240_p0 = scmp.ne.s32.totalorder %s2757_s11, %s2753_s10 }
   0x9   : > { %p228_p1 = scmp.eq.s32.totalorder %s227_s17, 0  ;;  %p241_p2 = scmp.eq.s32.totalorder %s2846_s13, 1 }
   0xa   : > { %p246_p3 = scmp.ne.s32.totalorder %s2753_s10, %s2749_s30  ;;  %p247_p4 = scmp.eq.s32.totalorder %s1994_s14, 1 }
   0xb   : > { %s2861_s18 = scalar_select %p228_p1, %s2757_s11, %s230_s16  }
   0xc   : > { %p2863_p5 = por %p241_p2, %p240_p0  ;;  %p2867_p6 = por %p247_p4, %p246_p3 }
   0xd   : > { %3280 = sst [smem:[#allocation13_spill]] %s2861_s18  ;;  %p1995_p7 = scmp.ge.s32.totalorder %s2761_s12, 1 }
   0xe   : > { %s3281_s19 = scalar_select %p2863_p5, 1, 0 }
   0xf   : > { %s3282_s20 = scalar_select %p2867_p6, 1, 0 }
  0x10   : > { %p254_p8 = scmp.lt.s32.totalorder %s2761_s12, 3  ;;  %p3272_p9 = scmp.eq.s32.totalorder %s2846_s13, 0 }
  0x11   : > { %s2763_s22 = smov [#allocation2]   ;;  %s2764_s25 = smov [#allocation5]  }
  0x12   : > { %p2874_p10 = pnand %p1995_p7, %p254_p8  ;;  %s269_s23 = sshll.u32 %s2763_s22, 4  ;;  %s270_s23 = int_to_ptr.vmem [resolvable:$true] %s269_s23 }
  0x13   : > { %s291_s26 = sshll.u32 %s2764_s25, 4  ;;  %s2635_s29 = scalar_lea.hbm %s3265_s3, 9216  ;;  %s2886_s26 = int_to_ptr.vmem [resolvable:$true] %s291_s26 }
  0x14   : > { %s3283_s21 = scalar_select %p2874_p10, 1, 0 }
  0x15   : > { %p2466_p11 = pneg %p2874_p10  ;;  %p2636_p13 = scmp.ne.s32.totalorder %s3265_s3, %s2635_s29 }
  0x16   : > { %p2642_p3 = scmp.lt.u32.totalorder %s2635_s29, %s3265_s3 }
  0x17   : > { %p2882_p12 = pnand %p3272_p9, %p2466_p11 }
  0x19   : > { %p2637_p0 = pneg %p2882_p12 }
  0x1b   : > { %p2638_p1 = pnand %p2637_p0, %p2636_p13 }
  0x1d   : > { %p2639_p2 = pneg %p2638_p1 }
  0x1f   : > { %p2644_p4 = pnand %p2642_p3, %p2639_p2 }
  0x21   : > { %2647 = shalt.err (!%p2644_p4)
}
  0x22   : > { %s2648_s25 = scalar_lea.vmem %s270_s23, 9216  ;;  %p2656_p9 = scmp.lt.s32.totalorder %s270_s23, %s270_s23 }
  0x23   : > { %p2649_p7 = scmp.ne.s32.totalorder %s270_s23, %s2648_s25  ;;  %p2657_p6 = scmp.lt.s32.totalorder %s2648_s25, %s2648_s25 }
  0x25   : > { %p2651_p8 = pnand %p2649_p7, %p2637_p0  ;;  %p2658_p5 = por %p2657_p6, %p2656_p9 }
  0x27   : > { %p2652_p11 = pneg %p2651_p8 }
  0x29   : > { %p2659_p10 = pnand %p2658_p5, %p2652_p11 }
  0x2b   : > { %2662 = shalt.err (!%p2659_p10)
}
  0x2c   : > { %s2765_s27 = smov 64   ;;  %s2766_s28 = smov 4  }
  0x2d   : > { %2469 = dma.hbm_to_vmem [thread:$0]  (!%p2882_p12), %s3265_s3, 9216, %s270_s23, [#allocation3], %s2765_s27, %s2765_s27, %s2766_s28  }
  0x2e   : > { %s2663_s22 = scalar_lea.hbm %s3269_s7, 1024 }
  0x2f   : > { %p2664_p13 = scmp.ne.s32.totalorder %s3269_s7, %s2663_s22  ;;  %p2670_p9 = scmp.lt.u32.totalorder %s2663_s22, %s3269_s7 }
  0x31   : > { %p2666_p5 = pnand %p2664_p13, %p2637_p0 }
  0x33   : > { %p2667_p6 = pneg %p2666_p5 }
  0x35   : > { %p2672_p10 = pnand %p2670_p9, %p2667_p6 }
  0x37   : > { %2675 = shalt.err (!%p2672_p10)
}
  0x38   : > { %s2676_s23 = scalar_lea.vmem %s2886_s26, 1024  ;;  %p2684_p4 = scmp.lt.s32.totalorder %s2886_s26, %s2886_s26 }
  0x39   : > { %p2677_p1 = scmp.ne.s32.totalorder %s2886_s26, %s2676_s23  ;;  %p2685_p7 = scmp.lt.s32.totalorder %s2676_s23, %s2676_s23 }
  0x3b   : > { %p2679_p2 = pnand %p2677_p1, %p2637_p0  ;;  %p2686_p8 = por %p2685_p7, %p2684_p4 }
  0x3d   : > { %p2680_p3 = pneg %p2679_p2 }
  0x3f   : > { %p2687_p11 = pnand %p2686_p8, %p2680_p3 }
  0x41   : > { %2690 = shalt.err (!%p2687_p11)
}
  0x42   : > { %2472 = dma.hbm_to_vmem [thread:$0]  (!%p2882_p12), %s3269_s7, 1024, %s2886_s26, [#allocation6], %s2765_s27, %s2765_s27, %s2766_s28  }
  0x43   : > { %p3285_p13 = scmp.ne.s32.totalorder %s3283_s21, 0 }
  0x44   : > { %p3286_p5 = scmp.eq.s32.totalorder (!%p3285_p13), %s2846_s13, 0 }
  0x45   : > { %328 = sbr.rel (%p3285_p13) target bundleno = 2690 (0xa82), region = 56 }
  0x4c   : > { %2736 = dma.done.wait (%p3286_p5), [#allocation3], 9216   ;;  %p3287_p0 = pmov %p3286_p5 }
  0x4e   : > { %2738 = vsyncadd (%p3287_p0), [#allocation3], 4294958080  ;;  %p3288_p6 = pmov %p3287_p0 }
  0x4f   : > { %p3289_p9 = pmov %p3287_p0 }
  0x50   : > { %2740 = dma.done.wait (%p3288_p6), [#allocation6], 1024  }
  0x51   : > { %2742 = vsyncadd (%p3289_p9), [#allocation6], 4294966272  ;;  %s2003_s18 = sshll.u32 %s2846_s13, 1  ;;  %v2767_v0 = vmov 0   ;;  %v2768_v1 = vmov 0.0   ;;  %v2527_v7 = vld [vmem:[%s3264_s2] sm:$0xff]   ;;  %v391_v23 = vlaneseq }
  0x52   : > { %2525 = vset.pattern.permute.xlu0 %v2767_v0  ;;  %p374_p12 = scmp.lt.s32.totalorder %s2003_s18, 3  ;;  %2526 = vset.pattern.permute.xlu1 %v2767_v0  ;;  %v2528_v9 = vld [vmem:[%s3264_s2 + $0x8] sm:$0xff]   ;;  %v2529_v10 = vld [vmem:[%s3264_s2 + $0x10] sm:$0xff]   ;;  %vm2769_vm0 = vmmov 0   ;;  %v2530_v12 = vld [vmem:[%s3264_s2 + $0x18] sm:$0xff]   ;;  %vm2771_vm11 = vmmov 1  }
  0x53   : > { %2236 = vmatprep.subr.bf16.mxu0 %v2768_v1  ;;  %2256 = vmatprep.subr.bf16.mxu1 %v2768_v1  ;;  %v2535_v11 = vld [vmem:[#allocation2 + $0x40] sm:$0xff]   ;;  %v2536_v13 = vld [vmem:[#allocation2 + $0x48] sm:$0xff]   ;;  %v2531_v14 = vld [vmem:[%s3264_s2 + $0x20] sm:$0xff]   ;;  %v2997_v24 = vand.u32 127, %v391_v23  ;;  %v2770_v30 = vmov 1.0|1.0  }
  0x54   : > { %s3302_s18 = smov (!%p374_p12, %s2003_s18), 3  ;;  %2237 = vmatpush3.bf16.msra.mxu0 %v2527_v7  ;;  %2252 = vmatprep.mubr.msk.bf16.mxu0 %vm2769_vm0, %v2768_v1  ;;  %v2538_v15 = vld [vmem:[#allocation2 + $0x50] sm:$0xff]   ;;  %v2532_v16 = vld [vmem:[%s3264_s2 + $0x28] sm:$0xff]   ;;  %v2540_v17 = vld [vmem:[#allocation2 + $0x58] sm:$0xff]   ;;  %v3014_v39 = vshrl.u32 %v391_v23, 7  ;;  %s370_s15 = sand.u32 1, %s2753_s10  }
  0x55   : > { %s2004_s21 = sshll.u32 %s3302_s18, 3  ;;  %2238 = vmatprep.subr.bf16.mxu0 %v2768_v1  ;;  %2272 = vmatprep.mubr.msk.bf16.mxu1 %vm2769_vm0, %v2768_v1  ;;  %v2533_v18 = vld [vmem:[%s3264_s2 + $0x30] sm:$0xff]   ;;  %v2542_v19 = vld [vmem:[#allocation2 + $0x60] sm:$0xff]   ;;  %v2534_v20 = vld [vmem:[%s3264_s2 + $0x38] sm:$0xff]   ;;  %vm548_vm15 = vcmp.lt.s32.totalorder %v2997_v24, 32  ;;  %s2002_s18 = sshll.u32 %s370_s15, 4 }
  0x56   : > { %s377_s27 = scalar_lea.vmem %s3262_s0, %s2004_s21  ;;  %s383_s14 = scalar_lea.vmem %s3263_s1, %s2004_s21  ;;  %2257 = vmatpush3.bf16.msra.mxu1 %v2535_v11  ;;  %v2544_v21 = vld [vmem:[#allocation2 + $0x68] sm:$0xff]   ;;  %v2546_v22 = vld [vmem:[#allocation2 + $0x70] sm:$0xff]   ;;  %v2537_v29 = vld [vmem:[#allocation2] sm:$0xff]   ;;  %v528_v40 = vand.u32 15, %v3014_v39  ;;  %vm576_vm8 = vcmp.lt.s32.totalorder %v3014_v39, 1  ;;  %vm795_vm9 = vcmp.lt.s32.totalorder %v3014_v39, 7 }
  0x57   : > { %v387_v2 = vld [vmem:[%s377_s27] sm:$0xff]  ;;  %v390_v4 = vld [vmem:[%s383_s14 + $0x8] sm:$0xff]  ;;  %2258 = vmatprep.subr.bf16.mxu1 %v2768_v1  ;;  %v2539_v31 = vld [vmem:[#allocation2 + $0x8] sm:$0xff]   ;;  %v523_v63 = vadd.s32 8, %v3014_v39  ;;  %s2136_s21 = sshll.u32 %s2846_s13, 8  ;;  %s372_s24 = scalar_lea.vmem [#allocation7], %s2002_s18 }
  0x58   : > { %v389_v3 = vld [vmem:[%s383_s14] sm:$0xff]  ;;  %394 = vperm.xlu0 %2525, %v387_v2   ;;  %v388_v6 = vld [vmem:[%s377_s27 + $0x8] sm:$0xff]  ;;  %v402_v8 = vadd.s32 51, %v390_v4  ;;  %2239 = vmatpush3.bf16.msra.mxu0 %v2528_v9  ;;  %v2541_v32 = vld [vmem:[#allocation2 + $0x10] sm:$0xff]   ;;  %v549_v41 = vadd.s32 4294967295, %v528_v40  ;;  %s1898_s26 = sshll.u32 %s372_s24, 4  ;;  %s3217_s29 = scalar_lea.hbm %s3271_s9, %s2136_s21  ;;  %s3219_s26 = int_to_ptr.vmem [resolvable:$true] %s1898_s26 }
  0x59   : > { %v401_v5 = vadd.s32 51, %v389_v3  ;;  %2240 = vmatprep.subr.bf16.mxu0 %v2768_v1  ;;  %v2543_v33 = vld [vmem:[#allocation2 + $0x18] sm:$0xff]   ;;  %v2545_v34 = vld [vmem:[#allocation2 + $0x20] sm:$0xff]   ;;  %v2547_v35 = vld [vmem:[#allocation2 + $0x28] sm:$0xff]   ;;  %v535_v2 = vand.u32 15, %v523_v63  ;;  %s3221_s14 = scalar_lea.sflag [#allocation4], %s370_s15 }
  0x5a   : > { %2259 = vmatpush3.bf16.msra.mxu1 %v2536_v13  ;;  %v2548_v36 = vld [vmem:[#allocation2 + $0x78] sm:$0xff]   ;;  %v2549_v37 = vld [vmem:[#allocation2 + $0x30] sm:$0xff]   ;;  %v2551_v46 = vld [vmem:[#allocation2 + $0x80] sm:$0xff]   ;;  %vm551_vm10 = vcmp.ge.s32.totalorder %v549_v41, 0  ;;  %s2691_s13 = scalar_lea.vmem %s3219_s26, 256  ;;  %p3294_p1 = scmp.ne.s32.totalorder %s3281_s19, 0 }
  0x5b   : > { %404 = vperm.xlu1 %2526, %v401_v5   ;;  %2260 = vmatprep.subr.bf16.mxu1 %v2768_v1  ;;  %v2550_v38 = vld [vmem:[#allocation2 + $0x38] sm:$0xff]   ;;  %vm3028_vm12 = vmpackc.low %vm2771_vm11, %vm551_vm10  ;;  %v2552_v59 = vld [vmem:[#allocation2 + $0x88] sm:$0xff]   ;;  %v562_v4 = vadd.s32 1, %v535_v2  ;;  %p2692_p10 = scmp.ne.s32.totalorder %s3219_s26, %s2691_s13  ;;  %s2772_s16 = smov [#allocation7]  }
  0x5c   : > { %397 = vperm.xlu0 %2525, %v388_v6   ;;  %2241 = vmatpush3.bf16.msra.mxu0 %v2529_v10  ;;  %v2553_v60 = vld [vmem:[#allocation2 + $0x90] sm:$0xff]   ;;  %v2554_v61 = vld [vmem:[#allocation2 + $0x98] sm:$0xff]   ;;  %v2555_v62 = vld [vmem:[#allocation2 + $0xa0] sm:$0xff]   ;;  %s2695_s17 = sshll.u32 %s2772_s16, 4  ;;  %s2696_s17 = int_to_ptr.vmem [resolvable:$false] %s2695_s17 }
  0x5d   : > { %2242 = vmatprep.subr.bf16.mxu0 %v2768_v1  ;;  %v2556_v0 = vld [vmem:[#allocation2 + $0xa8] sm:$0xff]   ;;  %v2557_v3 = vld [vmem:[#allocation2 + $0xb0] sm:$0xff]   ;;  %v2558_v5 = vld [vmem:[#allocation2 + $0xb8] sm:$0xff]   ;;  %vm566_vm13 = vcmp.lt.s32.totalorder %v562_v4, 16  ;;  %p2693_p2 = pnand %p2692_p10, %p3294_p1  ;;  %s2697_s22 = scalar_lea.vmem %s2696_s17, 512 }
  0x5e   : > { %2261 = vmatpush3.bf16.msra.mxu1 %v2538_v15  ;;  %vm3047_vm14 = vmpackc.low %vm566_vm13, %vm2771_vm11  ;;  %v2605_v56 = vld [vmem:[#allocation2 + $0x230] sm:$0xff]   ;;  %v2117_v39 = vld [vmem:[%s3266_s4 + $0x2] ss:$0 sm:$0xff]  ;;  %p2698_p4 = scmp.lt.s32.totalorder %s3219_s26, %s2696_s17  ;;  %p2699_p7 = scmp.lt.s32.totalorder %s2697_s22, %s2691_s13 }
  0x5f   : > { %407 = vperm.xlu1 %2526, %v402_v8   ;;  %2262 = vmatprep.subr.bf16.mxu1 %v2768_v1  ;;  %p2694_p3 = pneg %p2693_p2 }
  0x60   : > { %2243 = vmatpush3.bf16.msra.mxu0 %v2530_v12  ;;  %p2700_p8 = por %p2699_p7, %p2698_p4 }
  0x61   : > { %2244 = vmatprep.subr.bf16.mxu0 %v2768_v1 }
  0x62   : > { %2263 = vmatpush3.bf16.msra.mxu1 %v2540_v17  ;;  %p2701_p11 = pnand %p2700_p8, %p2694_p3 }
  0x63   : > { %2264 = vmatprep.subr.bf16.mxu1 %v2768_v1 }
  0x64   : > { %2245 = vmatpush3.bf16.msra.mxu0 %v2531_v14 }
  0x65   : > { %2246 = vmatprep.subr.bf16.mxu0 %v2768_v1 }
  0x66   : > { %2265 = vmatpush3.bf16.msra.mxu1 %v2542_v19 }
  0x67   : > { %2266 = vmatprep.subr.bf16.mxu1 %v2768_v1 }
  0x68   : > { %2247 = vmatpush3.bf16.msra.mxu0 %v2532_v16 }
  0x69   : > { %2248 = vmatprep.subr.bf16.mxu0 %v2768_v1 }
  0x6a   : > { %2267 = vmatpush3.bf16.msra.mxu1 %v2544_v21 }
  0x6b   : > { %2268 = vmatprep.subr.bf16.mxu1 %v2768_v1 }
  0x6c   : > { %2249 = vmatpush3.bf16.msra.mxu0 %v2533_v18  ;;  %v2047_v18 = vld [vmem:[%s3266_s4] ss:$0 sm:$0xff] }
  0x6d   : > { %2250 = vmatprep.subr.bf16.mxu0 %v2768_v1 }
  0x6e   : > { %2269 = vmatpush3.bf16.msra.mxu1 %v2546_v22 }
  0x6f   : > { %2270 = vmatprep.subr.bf16.mxu1 %v2768_v1 }
  0x70   : > { %2251 = vmatpush3.bf16.msra.mxu0 %v2534_v20 }
  0x71   : > { %2276 = vmatprep.subr.bf16.mxu0 %v2768_v1 }
  0x72   : > { %2271 = vmatpush3.bf16.msra.mxu1 %v2548_v36 }
  0x73   : > { %2296 = vmatprep.subr.bf16.mxu1 %v2768_v1 }
  0xd7   : > { %v395_v25 = vpop.permute.xlu0 %394 }
  0xd8   : > { %vm399_vm1 = vcmp.eq.s32.totalorder %v2997_v24, %v395_v25 }
  0xda   : > { %v405_v26 = vpop.permute.xlu1 %404 }
  0xdb   : > { %vm409_vm2 = vcmp.eq.s32.totalorder %v2997_v24, %v405_v26  ;;  %v398_v27 = vpop.permute.xlu0 %397 }
  0xdc   : > { %vm411_vm3 = vmor %vm399_vm1, %vm409_vm2  ;;  %vm400_vm4 = vcmp.eq.s32.totalorder %v2997_v24, %v398_v27 }
  0xde   : > { %v408_v28 = vpop.permute.xlu1 %407 }
  0xdf   : > { %vm410_vm5 = vcmp.eq.s32.totalorder %v2997_v24, %v408_v28 }
  0xe0   : > { %vm412_vm6 = vmor %vm400_vm4, %vm410_vm5 }
  0xe1   : > { %vm2015_vm7 = vmpackc.low %vm412_vm6, %vm411_vm3 }
  0xe2   : > { %2253 = vmatmul.mubr.msk.bf16.vlgmr.msra.gmra.mrb[0].mxu0 %vm2015_vm7, %v2770_v30  ;;  %v2561_v30 = vld [vmem:[#allocation2 + $0xc0] sm:$0xff]  }
  0xe3   : > { %2277 = vmatpush3.bf16.msra.mxu0 %v2537_v29  ;;  %2292 = vmatprep.mubr.msk.bf16.mxu0 %vm2769_vm0, %v2768_v1  ;;  %v2559_v29 = vld [vmem:[#allocation2 + $0x100] sm:$0xff]  }
  0xe4   : > { %2278 = vmatprep.subr.bf16.mxu0 %v2768_v1 }
  0xe7   : > { %2279 = vmatpush3.bf16.msra.mxu0 %v2539_v31  ;;  %v2560_v31 = vld [vmem:[#allocation2 + $0x108] sm:$0xff]  }
  0xe8   : > { %2280 = vmatprep.subr.bf16.mxu0 %v2768_v1 }
  0xeb   : > { %2281 = vmatpush3.bf16.msra.mxu0 %v2541_v32 }
  0xec   : > { %2282 = vmatprep.subr.bf16.mxu0 %v2768_v1 }
  0xef   : > { %2283 = vmatpush3.bf16.msra.mxu0 %v2543_v33 }
  0xf0   : > { %2284 = vmatprep.subr.bf16.mxu0 %v2768_v1 }
  0xf3   : > { %2285 = vmatpush3.bf16.msra.mxu0 %v2545_v34 }
  0xf4   : > { %2286 = vmatprep.subr.bf16.mxu0 %v2768_v1 }
  0xf7   : > { %2287 = vmatpush3.bf16.msra.mxu0 %v2547_v35 }
  0xf8   : > { %2288 = vmatprep.subr.bf16.mxu0 %v2768_v1 }
  0xfb   : > { %2289 = vmatpush3.bf16.msra.mxu0 %v2549_v37 }
  0xfc   : > { %2290 = vmatprep.subr.bf16.mxu0 %v2768_v1 }
  0xff   : > { %2291 = vmatpush3.bf16.msra.mxu0 %v2550_v38 }
 0x100   : > { %2316 = vmatprep.subr.bf16.mxu0 %v2768_v1 }
 0x1b5   : > { %v514_v42 = vpop.f32.mrb[0].mxu0 }
 0x1b6   : > { %v2254_v43 = vpop.f32.mrb[1].mxu0  ;;  %v574_v44 = vrot.slane %v514_v42, 7  ;;  %v793_v47 = vrot.slane %v514_v42, 1 }
 0x1b7   : > { %v517_v45 = vpop.f32.mrb[2].mxu0  ;;  %v2562_v43 = vld [vmem:[#allocation2 + $0x110] sm:$0xff]  }
 0x1b8   : > { %v573_v48 = vpack.c.bf16 %v517_v45, %v514_v42  ;;  %v575_v49 = vrot.slane %v517_v45, 7  ;;  %v794_v50 = vrot.slane %v517_v45, 1  ;;  %v2255_v51 = vpop.f32.mrb[3].mxu0  ;;  %v2564_v45 = vld [vmem:[#allocation2 + $0x118] sm:$0xff]  }
 0x1b9   : > { %v2570_v51 = vld [vmem:[#allocation2 + $0x130] sm:$0xff]  }
 0x1ba   : > { %v577_v52 = vsel %vm576_vm8, %v574_v44, %v575_v49  ;;  %v578_v53 = vsel %vm576_vm8, %v575_v49, %v574_v44  ;;  %v796_v54 = vsel %vm795_vm9, %v793_v47, %v794_v50  ;;  %v797_v55 = vsel %vm795_vm9, %v794_v50, %v793_v47  ;;  %2273 = vmatmul.mubr.bf16.vlgmr.msra.gmra.mrb[0].mxu1 %v573_v48  ;;  %v2563_v44 = vld [vmem:[#allocation2 + $0xc8] sm:$0xff]   ;;  %v2566_v47 = vld [vmem:[#allocation2 + $0x120] sm:$0xff]   ;;  %v2567_v48 = vld [vmem:[#allocation2 + $0xd8] sm:$0xff]  }
 0x1bb   : > { %v2034_v57 = vpack.c.bf16 %v577_v52, %v578_v53  ;;  %v2045_v58 = vpack.c.bf16 %v797_v55, %v796_v54  ;;  %2297 = vmatpush3.bf16.msra.mxu1 %v2551_v46  ;;  %2312 = vmatprep.mubr.msk.bf16.mxu1 %vm2769_vm0, %v2768_v1  ;;  %v2565_v46 = vld [vmem:[#allocation2 + $0xd0] sm:$0xff]   ;;  %v2568_v49 = vld [vmem:[#allocation2 + $0x128] sm:$0xff]   ;;  %v2569_v50 = vld [vmem:[#allocation2 + $0xe0] sm:$0xff]  }
 0x1bc   : > { %2298 = vmatprep.subr.bf16.mxu1 %v2768_v1  ;;  %v2571_v52 = vld [vmem:[#allocation2 + $0xe8] sm:$0xff]   ;;  %v2572_v53 = vld [vmem:[#allocation2 + $0x138] sm:$0xff]   ;;  %v2573_v54 = vld [vmem:[#allocation2 + $0xf0] sm:$0xff]  }
 0x1bd   : > { %2293 = vmatmul.mubr.msk.bf16.vlgmr.msra.gmra.mrb[4].mxu0 %vm3028_vm12, %v2034_v57  ;;  %v2574_v55 = vld [vmem:[#allocation2 + $0xf8] sm:$0xff]  }
 0x1be   : > { %2332 = vmatprep.mubr.msk.bf16.mxu0 %vm2769_vm0, %v2768_v1  ;;  %2317 = vmatpush3.bf16.msra.mxu0 %v2559_v29 }
 0x1bf   : > { %2299 = vmatpush3.bf16.msra.mxu1 %v2552_v59  ;;  %2318 = vmatprep.subr.bf16.mxu0 %v2768_v1 }
 0x1c0   : > { %2300 = vmatprep.subr.bf16.mxu1 %v2768_v1 }
 0x1c2   : > { %2319 = vmatpush3.bf16.msra.mxu0 %v2560_v31 }
 0x1c3   : > { %2301 = vmatpush3.bf16.msra.mxu1 %v2553_v60  ;;  %2320 = vmatprep.subr.bf16.mxu0 %v2768_v1 }
 0x1c4   : > { %2302 = vmatprep.subr.bf16.mxu1 %v2768_v1 }
 0x1c6   : > { %2321 = vmatpush3.bf16.msra.mxu0 %v2562_v43  ;;  %v2081_v43 = vld [vmem:[%s3266_s4 + $0x1] ss:$0 sm:$0xff] }
 0x1c7   : > { %2303 = vmatpush3.bf16.msra.mxu1 %v2554_v61  ;;  %2322 = vmatprep.subr.bf16.mxu0 %v2768_v1 }
 0x1c8   : > { %2304 = vmatprep.subr.bf16.mxu1 %v2768_v1 }
 0x1ca   : > { %2323 = vmatpush3.bf16.msra.mxu0 %v2564_v45 }
 0x1cb   : > { %2305 = vmatpush3.bf16.msra.mxu1 %v2555_v62  ;;  %2324 = vmatprep.subr.bf16.mxu0 %v2768_v1 }
 0x1cc   : > { %2306 = vmatprep.subr.bf16.mxu1 %v2768_v1 }
 0x1ce   : > { %2325 = vmatpush3.bf16.msra.mxu0 %v2566_v47 }
 0x1cf   : > { %2307 = vmatpush3.bf16.msra.mxu1 %v2556_v0  ;;  %2326 = vmatprep.subr.bf16.mxu0 %v2768_v1  ;;  %v2048_v0 = vld [vmem:[%s3267_s5] ss:$0 sm:$0xff] }
 0x1d0   : > { %2308 = vmatprep.subr.bf16.mxu1 %v2768_v1 }
 0x1d2   : > { %2327 = vmatpush3.bf16.msra.mxu0 %v2568_v49 }
 0x1d3   : > { %2309 = vmatpush3.bf16.msra.mxu1 %v2557_v3  ;;  %2328 = vmatprep.subr.bf16.mxu0 %v2768_v1 }
 0x1d4   : > { %2310 = vmatprep.subr.bf16.mxu1 %v2768_v1 }
 0x1d6   : > { %2329 = vmatpush3.bf16.msra.mxu0 %v2570_v51 }
 0x1d7   : > { %2311 = vmatpush3.bf16.msra.mxu1 %v2558_v5  ;;  %2330 = vmatprep.subr.bf16.mxu0 %v2768_v1  ;;  %v2049_v5 = vld [vmem:[%s3268_s6] ss:$0 sm:$0xff] }
 0x1d8   : > { %2336 = vmatprep.subr.bf16.mxu1 %v2768_v1 }
 0x1da   : > { %2313 = vmatmul.mubr.msk.bf16.vlgmr.msra.gmra.mrb[4].mxu1 %vm3047_vm14, %v2045_v58  ;;  %2331 = vmatpush3.bf16.msra.mxu0 %v2572_v53  ;;  %v2583_v53 = vld [vmem:[#allocation2 + $0x1c0] sm:$0xff]  }
 0x1db   : > { %2352 = vmatprep.mubr.msk.bf16.mxu1 %vm2769_vm0, %v2768_v1  ;;  %2337 = vmatpush3.bf16.msra.mxu1 %v2561_v30 }
 0x1dc   : > { %2338 = vmatprep.subr.bf16.mxu1 %v2768_v1  ;;  %2356 = vmatprep.subr.bf16.mxu0 %v2768_v1 }
 0x1df   : > { %2339 = vmatpush3.bf16.msra.mxu1 %v2563_v44 }
 0x1e0   : > { %2340 = vmatprep.subr.bf16.mxu1 %v2768_v1 }
 0x1e3   : > { %2341 = vmatpush3.bf16.msra.mxu1 %v2565_v46 }
 0x1e4   : > { %2342 = vmatprep.subr.bf16.mxu1 %v2768_v1 }
 0x1e7   : > { %2343 = vmatpush3.bf16.msra.mxu1 %v2567_v48 }
 0x1e8   : > { %2344 = vmatprep.subr.bf16.mxu1 %v2768_v1 }
 0x1eb   : > { %2345 = vmatpush3.bf16.msra.mxu1 %v2569_v50 }
 0x1ec   : > { %2346 = vmatprep.subr.bf16.mxu1 %v2768_v1 }
 0x1ef   : > { %2347 = vmatpush3.bf16.msra.mxu1 %v2571_v52 }
 0x1f0   : > { %2348 = vmatprep.subr.bf16.mxu1 %v2768_v1 }
 0x1f3   : > { %2349 = vmatpush3.bf16.msra.mxu1 %v2573_v54  ;;  %v2585_v54 = vld [vmem:[#allocation2 + $0x180] sm:$0xff]  }
 0x1f4   : > { %2350 = vmatprep.subr.bf16.mxu1 %v2768_v1 }
 0x1f7   : > { %2351 = vmatpush3.bf16.msra.mxu1 %v2574_v55  ;;  %v2584_v55 = vld [vmem:[#allocation2 + $0x1c8] sm:$0xff]  }
 0x1f8   : > { %2376 = vmatprep.subr.bf16.mxu1 %v2768_v1 }
 0x28d   : > { %v697_v7 = vpop.f32.mrb[0].mxu1 }
 0x28e   : > { %v2274_v8 = vpop.f32.mrb[1].mxu1 }
 0x28f   : > { %v700_v9 = vpop.f32.mrb[2].mxu1 }
 0x290   : > { %v2275_v10 = vpop.f32.mrb[3].mxu1  ;;  %v786_v11 = vpop.f32.mrb[4].mxu0 }
 0x291   : > { %v787_v12 = vadd.f32 %v786_v11, %v697_v7  ;;  %v2294_v13 = vpop.f32.mrb[5].mxu0  ;;  %v2575_v11 = vld [vmem:[#allocation2 + $0x140] sm:$0xff]  }
 0x292   : > { %v789_v14 = vpop.f32.mrb[6].mxu0 }
 0x293   : > { %v790_v15 = vadd.f32 %v789_v14, %v700_v9  ;;  %v2295_v16 = vpop.f32.mrb[7].mxu0 }
 0x2ad   : > { %v900_v17 = vpop.f32.mrb[4].mxu1 }
 0x2ae   : > { %v907_v19 = vadd.f32 %v900_v17, %v787_v12  ;;  %v2314_v20 = vpop.f32.mrb[5].mxu1 }
 0x2af   : > { %v903_v21 = vpop.f32.mrb[6].mxu1  ;;  %v2578_v20 = vld [vmem:[#allocation2 + $0x158] sm:$0xff]  }
 0x2b0   : > { %v908_v22 = vadd.f32 %v903_v21, %v790_v15  ;;  %v2315_v23 = vpop.f32.mrb[7].mxu1  ;;  %v916_v25 = vadd.f32 %v2047_v18, %v907_v19  ;;  %v2577_v19 = vld [vmem:[#allocation2 + $0x150] sm:$0xff]   ;;  %v2579_v21 = vld [vmem:[#allocation2 + $0x160] sm:$0xff]  }
 0x2b1   : > { %v2581_v23 = vld [vmem:[#allocation2 + $0x170] sm:$0xff]  }
 0x2b2   : > { %v918_v26 = vmax.f32 %v916_v25, 0.0  ;;  %v917_v27 = vadd.f32 %v2047_v18, %v908_v22  ;;  %v2576_v18 = vld [vmem:[#allocation2 + $0x148] sm:$0xff]  }
 0x2b3   : > { %v2580_v22 = vld [vmem:[#allocation2 + $0x168] sm:$0xff]  }
 0x2b4   : > { %920 = vadd.xlane.f32.xlu0 %v918_v26  ;;  %v919_v28 = vmax.f32 %v917_v27, 0.0 }
 0x2b6   : > { %922 = vadd.xlane.f32.xlu1 %v919_v28 }
 0x341   : > { %v921_v32 = vpop.xlane.xlu0 %920 }
 0x342   : > { %v924_v33 = vmul.f32 0.03125, %v921_v32 }
 0x343   : > { %v923_v34 = vpop.xlane.xlu1 %922 }
 0x344   : > { %v926_v35 = vsub.f32 %v918_v26, %v924_v33  ;;  %v925_v36 = vmul.f32 0.03125, %v923_v34  ;;  %v2582_v26 = vld [vmem:[#allocation2 + $0x178] sm:$0xff]  }
 0x346   : > { %v927_v37 = vsub.f32 %v919_v28, %v925_v36  ;;  %v928_v38 = vsel %vm548_vm15, %v926_v35, 0.0 }
 0x347   : > { %v930_v40 = vmul.f32 %v928_v38, %v928_v38 }
 0x348   : > { %v929_v41 = vsel %vm548_vm15, %v927_v37, 0.0 }
 0x349   : > { %932 = vadd.xlane.f32.xlu0 %v930_v40  ;;  %v931_v42 = vmul.f32 %v929_v41, %v929_v41 }
 0x34d   : > { %934 = vadd.xlane.f32.xlu0 %v931_v42 }
 0x3d6   : > { %v933_v57 = vpop.xlane.xlu0 %932 }
 0x3d7   : > { %v936_v58 = vmul.f32 0.03125, %v933_v57 }
 0x3d9   : > { %v938_v59 = vadd.f32 1e-05, %v936_v58 }
 0x3da   : > { %v935_v60 = vpop.xlane.xlu0 %934 }
 0x3db   : > { %2615 = vrsqrt.f32 %v938_v59  ;;  %v937_v61 = vmul.f32 0.03125, %v935_v60 }
 0x3dd   : > { %v939_v62 = vadd.f32 1e-05, %v937_v61 }
 0x3df   : > { %2617 = vrsqrt.f32 %v939_v62 }
 0x3e5   : > { %v2616_v63 = vpop.eup %2615 }
 0x3e6   : > { %v942_v2 = vmul.f32 %v2616_v63, %v928_v38 }
 0x3e8   : > { %v951_v3 = vmul.f32 %v2048_v0, %v942_v2 }
 0x3e9   : > { %v2618_v4 = vpop.eup %2617 }
 0x3ea   : > { %v943_v7 = vmul.f32 %v2618_v4, %v929_v41  ;;  %v3086_v9 = vadd.f32 %v2049_v5, %v951_v3  ;;  %v2586_v4 = vld [vmem:[#allocation2 + $0x1d0] sm:$0xff]  }
 0x3ec   : > { %v952_v8 = vmul.f32 %v2048_v0, %v943_v7  ;;  %v963_v13 = vrot.slane %v3086_v9, 7  ;;  %v1182_v27 = vrot.slane %v3086_v9, 1  ;;  %v2588_v7 = vld [vmem:[#allocation2 + $0x1d8] sm:$0xff]  }
 0x3ee   : > { %v3088_v10 = vadd.f32 %v2049_v5, %v952_v8  ;;  %v2587_v5 = vld [vmem:[#allocation2 + $0x188] sm:$0xff]   ;;  %v2589_v8 = vld [vmem:[#allocation2 + $0x190] sm:$0xff]  }
 0x3f0   : > { %v962_v12 = vpack.c.bf16 %v3088_v10, %v3086_v9  ;;  %v964_v14 = vrot.slane %v3088_v10, 7  ;;  %v1183_v25 = vrot.slane %v3088_v10, 1 }
 0x3f2   : > { %2333 = vmatmul.mubr.bf16.vlgmr.msra.gmra.mrb[8].mxu0 %v962_v12  ;;  %v965_v15 = vsel %vm576_vm8, %v963_v13, %v964_v14  ;;  %v966_v16 = vsel %vm576_vm8, %v964_v14, %v963_v13  ;;  %v1184_v28 = vsel %vm795_vm9, %v1182_v27, %v1183_v25  ;;  %v1185_v29 = vsel %vm795_vm9, %v1183_v25, %v1182_v27  ;;  %v2591_v12 = vld [vmem:[#allocation2 + $0x198] sm:$0xff]   ;;  %v2592_v13 = vld [vmem:[#allocation2 + $0x1e8] sm:$0xff]   ;;  %v2593_v14 = vld [vmem:[#allocation2 + $0x1a0] sm:$0xff]  }
 0x3f3   : > { %2357 = vmatpush3.bf16.msra.mxu0 %v2575_v11  ;;  %v2067_v17 = vpack.c.bf16 %v965_v15, %v966_v16  ;;  %2372 = vmatprep.mubr.msk.bf16.mxu0 %vm2769_vm0, %v2768_v1  ;;  %v2078_v30 = vpack.c.bf16 %v1185_v29, %v1184_v28  ;;  %v2590_v11 = vld [vmem:[#allocation2 + $0x1e0] sm:$0xff]   ;;  %v2594_v15 = vld [vmem:[#allocation2 + $0x1f0] sm:$0xff]   ;;  %v2595_v16 = vld [vmem:[#allocation2 + $0x1a8] sm:$0xff]  }
 0x3f4   : > { %2358 = vmatprep.subr.bf16.mxu0 %v2768_v1  ;;  %v2083_v28 = vld [vmem:[%s3267_s5 + $0x1] ss:$0 sm:$0xff] }
 0x3f5   : > { %2353 = vmatmul.mubr.msk.bf16.vlgmr.msra.gmra.mrb[8].mxu1 %vm3028_vm12, %v2067_v17  ;;  %v2596_v17 = vld [vmem:[#allocation2 + $0x1f8] sm:$0xff]  }
 0x3f6   : > { %2392 = vmatprep.mubr.msk.bf16.mxu1 %vm2769_vm0, %v2768_v1  ;;  %2377 = vmatpush3.bf16.msra.mxu1 %v2583_v53 }
 0x3f7   : > { %2359 = vmatpush3.bf16.msra.mxu0 %v2576_v18  ;;  %2378 = vmatprep.subr.bf16.mxu1 %v2768_v1  ;;  %v2597_v18 = vld [vmem:[#allocation2 + $0x1b0] sm:$0xff]  }
 0x3f8   : > { %2360 = vmatprep.subr.bf16.mxu0 %v2768_v1 }
 0x3fa   : > { %2379 = vmatpush3.bf16.msra.mxu1 %v2584_v55 }
 0x3fb   : > { %2361 = vmatpush3.bf16.msra.mxu0 %v2577_v19  ;;  %2380 = vmatprep.subr.bf16.mxu1 %v2768_v1  ;;  %v2598_v19 = vld [vmem:[#allocation2 + $0x1b8] sm:$0xff]  }
 0x3fc   : > { %2362 = vmatprep.subr.bf16.mxu0 %v2768_v1 }
 0x3fe   : > { %2381 = vmatpush3.bf16.msra.mxu1 %v2586_v4 }
 0x3ff   : > { %2363 = vmatpush3.bf16.msra.mxu0 %v2578_v20  ;;  %2382 = vmatprep.subr.bf16.mxu1 %v2768_v1 }
 0x400   : > { %2364 = vmatprep.subr.bf16.mxu0 %v2768_v1 }
 0x402   : > { %2383 = vmatpush3.bf16.msra.mxu1 %v2588_v7 }
 0x403   : > { %2365 = vmatpush3.bf16.msra.mxu0 %v2579_v21  ;;  %2384 = vmatprep.subr.bf16.mxu1 %v2768_v1 }
 0x404   : > { %2366 = vmatprep.subr.bf16.mxu0 %v2768_v1 }
 0x406   : > { %2385 = vmatpush3.bf16.msra.mxu1 %v2590_v11 }
 0x407   : > { %2367 = vmatpush3.bf16.msra.mxu0 %v2580_v22  ;;  %2386 = vmatprep.subr.bf16.mxu1 %v2768_v1 }
 0x408   : > { %2368 = vmatprep.subr.bf16.mxu0 %v2768_v1 }
 0x40a   : > { %2387 = vmatpush3.bf16.msra.mxu1 %v2592_v13 }
 0x40b   : > { %2369 = vmatpush3.bf16.msra.mxu0 %v2581_v23  ;;  %2388 = vmatprep.subr.bf16.mxu1 %v2768_v1 }
 0x40c   : > { %2370 = vmatprep.subr.bf16.mxu0 %v2768_v1 }
 0x40e   : > { %2389 = vmatpush3.bf16.msra.mxu1 %v2594_v15 }
 0x40f   : > { %2371 = vmatpush3.bf16.msra.mxu0 %v2582_v26  ;;  %2390 = vmatprep.subr.bf16.mxu1 %v2768_v1 }
 0x410   : > { %2396 = vmatprep.subr.bf16.mxu0 %v2768_v1 }
 0x412   : > { %2373 = vmatmul.mubr.msk.bf16.vlgmr.msra.gmra.mrb[12].mxu0 %vm3047_vm14, %v2078_v30  ;;  %2391 = vmatpush3.bf16.msra.mxu1 %v2596_v17 }
 0x413   : > { %2412 = vmatprep.mubr.msk.bf16.mxu0 %vm2769_vm0, %v2768_v1  ;;  %2397 = vmatpush3.bf16.msra.mxu0 %v2585_v54 }
 0x414   : > { %2398 = vmatprep.subr.bf16.mxu0 %v2768_v1  ;;  %2416 = vmatprep.subr.bf16.mxu1 %v2768_v1 }
 0x417   : > { %2399 = vmatpush3.bf16.msra.mxu0 %v2587_v5 }
 0x418   : > { %2400 = vmatprep.subr.bf16.mxu0 %v2768_v1 }
 0x41b   : > { %2401 = vmatpush3.bf16.msra.mxu0 %v2589_v8 }
 0x41c   : > { %2402 = vmatprep.subr.bf16.mxu0 %v2768_v1 }
 0x41f   : > { %2403 = vmatpush3.bf16.msra.mxu0 %v2591_v12 }
 0x420   : > { %2404 = vmatprep.subr.bf16.mxu0 %v2768_v1 }
 0x423   : > { %2405 = vmatpush3.bf16.msra.mxu0 %v2593_v14 }
 0x424   : > { %2406 = vmatprep.subr.bf16.mxu0 %v2768_v1 }
 0x427   : > { %2407 = vmatpush3.bf16.msra.mxu0 %v2595_v16  ;;  %v2607_v16 = vld [vmem:[#allocation5] sm:$0xff]  }
 0x428   : > { %2408 = vmatprep.subr.bf16.mxu0 %v2768_v1 }
 0x42b   : > { %2409 = vmatpush3.bf16.msra.mxu0 %v2597_v18 }
 0x42c   : > { %2410 = vmatprep.subr.bf16.mxu0 %v2768_v1 }
 0x42f   : > { %2411 = vmatpush3.bf16.msra.mxu0 %v2598_v19 }
 0x430   : > { %2436 = vmatprep.subr.bf16.mxu0 %v2768_v1 }
 0x4c5   : > { %v1086_v31 = vpop.f32.mrb[8].mxu0 }
 0x4c6   : > { %v2334_v32 = vpop.f32.mrb[9].mxu0 }
 0x4c7   : > { %v1089_v33 = vpop.f32.mrb[10].mxu0 }
 0x4c8   : > { %v2335_v34 = vpop.f32.mrb[11].mxu0  ;;  %v1175_v35 = vpop.f32.mrb[8].mxu1 }
 0x4c9   : > { %v1176_v36 = vadd.f32 %v1175_v35, %v1086_v31  ;;  %v2354_v37 = vpop.f32.mrb[9].mxu1  ;;  %v2085_v31 = vld [vmem:[%s3268_s6 + $0x1] ss:$0 sm:$0xff] }
 0x4ca   : > { %v1178_v38 = vpop.f32.mrb[10].mxu1 }
 0x4cb   : > { %v1179_v40 = vadd.f32 %v1178_v38, %v1089_v33  ;;  %v2355_v41 = vpop.f32.mrb[11].mxu1 }
 0x4e5   : > { %v1288_v42 = vpop.f32.mrb[12].mxu0 }
 0x4e6   : > { %v1295_v44 = vadd.f32 %v1288_v42, %v1176_v36  ;;  %v2374_v45 = vpop.f32.mrb[13].mxu0 }
 0x4e7   : > { %v1291_v46 = vpop.f32.mrb[14].mxu0 }
 0x4e8   : > { %v1296_v47 = vadd.f32 %v1291_v46, %v1179_v40  ;;  %v2375_v48 = vpop.f32.mrb[15].mxu0  ;;  %v1305_v49 = vadd.f32 %v2081_v43, %v1295_v44  ;;  %v2599_v40 = vld [vmem:[#allocation2 + $0x200] sm:$0xff]   ;;  %v2600_v46 = vld [vmem:[#allocation2 + $0x208] sm:$0xff]  }
 0x4e9   : > { %v2603_v48 = vld [vmem:[#allocation2 + $0x220] sm:$0xff]  }
 0x4ea   : > { %v1307_v50 = vmax.f32 %v1305_v49, 0.0  ;;  %v1306_v51 = vadd.f32 %v2081_v43, %v1296_v47  ;;  %v2602_v47 = vld [vmem:[#allocation2 + $0x218] sm:$0xff]   ;;  %v2604_v49 = vld [vmem:[#allocation2 + $0x228] sm:$0xff]  }
 0x4ec   : > { %1309 = vadd.xlane.f32.xlu1 %v1307_v50  ;;  %v1308_v52 = vmax.f32 %v1306_v51, 0.0  ;;  %v2606_v51 = vld [vmem:[#allocation2 + $0x238] sm:$0xff]  }
 0x4ee   : > { %1311 = vadd.xlane.f32.xlu0 %v1308_v52 }
 0x579   : > { %v1310_v57 = vpop.xlane.xlu1 %1309 }
 0x57a   : > { %v1313_v58 = vmul.f32 0.03125, %v1310_v57 }
 0x57b   : > { %v1312_v59 = vpop.xlane.xlu0 %1311 }
 0x57c   : > { %v1315_v60 = vsub.f32 %v1307_v50, %v1313_v58  ;;  %v1314_v61 = vmul.f32 0.03125, %v1312_v59 }
 0x57e   : > { %v1316_v62 = vsub.f32 %v1308_v52, %v1314_v61  ;;  %v1317_v63 = vsel %vm548_vm15, %v1315_v60, 0.0 }
 0x57f   : > { %v1319_v0 = vmul.f32 %v1317_v63, %v1317_v63 }
 0x580   : > { %v1318_v2 = vsel %vm548_vm15, %v1316_v62, 0.0 }
 0x581   : > { %1321 = vadd.xlane.f32.xlu1 %v1319_v0  ;;  %v1320_v3 = vmul.f32 %v1318_v2, %v1318_v2 }
 0x583   : > { %1323 = vadd.xlane.f32.xlu0 %v1320_v3 }
 0x60e   : > { %v1322_v20 = vpop.xlane.xlu1 %1321 }
 0x60f   : > { %v1325_v21 = vmul.f32 0.03125, %v1322_v20 }
 0x610   : > { %v1324_v22 = vpop.xlane.xlu0 %1323 }
 0x611   : > { %v1327_v23 = vadd.f32 1e-05, %v1325_v21  ;;  %v1326_v25 = vmul.f32 0.03125, %v1324_v22 }
 0x613   : > { %2619 = vrsqrt.f32 %v1327_v23  ;;  %v1328_v26 = vadd.f32 1e-05, %v1326_v25 }
 0x615   : > { %2621 = vrsqrt.f32 %v1328_v26 }
 0x61d   : > { %v2620_v27 = vpop.eup %2619 }
 0x61e   : > { %v1331_v29 = vmul.f32 %v2620_v27, %v1317_v63 }
 0x61f   : > { %v2622_v30 = vpop.eup %2621 }
 0x620   : > { %v1341_v32 = vmul.f32 %v2083_v28, %v1331_v29  ;;  %v1332_v33 = vmul.f32 %v2622_v30, %v1318_v2  ;;  %v2609_v29 = vld [vmem:[#allocation5 + $0x10] sm:$0xff]   ;;  %v2610_v30 = vld [vmem:[#allocation5 + $0x18] sm:$0xff]  }
 0x622   : > { %v1351_v34 = vadd.f32 %v2085_v31, %v1341_v32  ;;  %v1342_v35 = vmul.f32 %v2083_v28, %v1332_v33  ;;  %v2608_v28 = vld [vmem:[#allocation5 + $0x8] sm:$0xff]   ;;  %v2613_v33 = vld [vmem:[#allocation5 + $0x30] sm:$0xff]  }
 0x623   : > { %v2612_v32 = vld [vmem:[#allocation5 + $0x28] sm:$0xff]  }
 0x624   : > { %v1352_v36 = vadd.f32 %v2085_v31, %v1342_v35  ;;  %v3152_v37 = vadd.f32 %v1351_v34, %v3086_v9  ;;  %v2611_v31 = vld [vmem:[#allocation5 + $0x20] sm:$0xff]   ;;  %v2614_v34 = vld [vmem:[#allocation5 + $0x38] sm:$0xff]  }
 0x626   : > { %v3155_v38 = vadd.f32 %v1352_v36, %v3088_v10  ;;  %v1356_v42 = vrot.slane %v3152_v37, 7  ;;  %v2601_v10 = vld [vmem:[#allocation2 + $0x210] sm:$0xff]   ;;  %v1575_v52 = vrot.slane %v3152_v37, 1 }
 0x628   : > { %v1355_v41 = vpack.c.bf16 %v3155_v38, %v3152_v37  ;;  %v1357_v43 = vrot.slane %v3155_v38, 7  ;;  %v1576_v50 = vrot.slane %v3155_v38, 1 }
 0x62a   : > { %2393 = vmatmul.mubr.bf16.vlgmr.msra.gmra.mrb[12].mxu1 %v1355_v41  ;;  %v1358_v44 = vsel %vm576_vm8, %v1356_v42, %v1357_v43  ;;  %v1359_v45 = vsel %vm576_vm8, %v1357_v43, %v1356_v42  ;;  %v1577_v53 = vsel %vm795_vm9, %v1575_v52, %v1576_v50  ;;  %v1578_v54 = vsel %vm795_vm9, %v1576_v50, %v1575_v52 }
 0x62b   : > { %2417 = vmatpush3.bf16.msra.mxu1 %v2599_v40  ;;  %v2103_v9 = vpack.c.bf16 %v1358_v44, %v1359_v45  ;;  %2432 = vmatprep.mubr.msk.bf16.mxu1 %vm2769_vm0, %v2768_v1  ;;  %v2114_v55 = vpack.c.bf16 %v1578_v54, %v1577_v53  ;;  %v2119_v45 = vld [vmem:[%s3267_s5 + $0x2] ss:$0 sm:$0xff]  ;;  %v2122_v53 = vld [vmem:[%s3270_s8] ss:$0 sm:$0xff] }
 0x62c   : > { %2418 = vmatprep.subr.bf16.mxu1 %v2768_v1 }
 0x62d   : > { %2413 = vmatmul.mubr.msk.bf16.vlgmr.msra.gmra.mrb[16].mxu0 %vm3028_vm12, %v2103_v9 }
 0x62e   : > { %2452 = vmatprep.mubr.msk.bf16.mxu0 %vm2769_vm0, %v2768_v1  ;;  %2437 = vmatpush3.bf16.msra.mxu0 %v2607_v16  ;;  %vm1861_vm0 = vcmp.lt.s32.totalorder %v2997_v24, 16 }
 0x62f   : > { %2419 = vmatpush3.bf16.msra.mxu1 %v2600_v46  ;;  %2438 = vmatprep.subr.bf16.mxu0 %v2768_v1 }
 0x630   : > { %2420 = vmatprep.subr.bf16.mxu1 %v2768_v1 }
 0x632   : > { %2439 = vmatpush3.bf16.msra.mxu0 %v2608_v28 }
 0x633   : > { %2421 = vmatpush3.bf16.msra.mxu1 %v2601_v10  ;;  %2440 = vmatprep.subr.bf16.mxu0 %v2768_v1 }
 0x634   : > { %2422 = vmatprep.subr.bf16.mxu1 %v2768_v1 }
 0x636   : > { %2441 = vmatpush3.bf16.msra.mxu0 %v2609_v29 }
 0x637   : > { %2423 = vmatpush3.bf16.msra.mxu1 %v2602_v47  ;;  %2442 = vmatprep.subr.bf16.mxu0 %v2768_v1 }
 0x638   : > { %2424 = vmatprep.subr.bf16.mxu1 %v2768_v1 }
 0x63a   : > { %2443 = vmatpush3.bf16.msra.mxu0 %v2610_v30 }
 0x63b   : > { %2425 = vmatpush3.bf16.msra.mxu1 %v2603_v48  ;;  %2444 = vmatprep.subr.bf16.mxu0 %v2768_v1 }
 0x63c   : > { %2426 = vmatprep.subr.bf16.mxu1 %v2768_v1 }
 0x63e   : > { %2445 = vmatpush3.bf16.msra.mxu0 %v2611_v31 }
 0x63f   : > { %2427 = vmatpush3.bf16.msra.mxu1 %v2604_v49  ;;  %2446 = vmatprep.subr.bf16.mxu0 %v2768_v1 }
 0x640   : > { %2428 = vmatprep.subr.bf16.mxu1 %v2768_v1 }
 0x642   : > { %2447 = vmatpush3.bf16.msra.mxu0 %v2612_v32 }
 0x643   : > { %2429 = vmatpush3.bf16.msra.mxu1 %v2605_v56  ;;  %2448 = vmatprep.subr.bf16.mxu0 %v2768_v1 }
 0x644   : > { %2430 = vmatprep.subr.bf16.mxu1 %v2768_v1 }
 0x646   : > { %2449 = vmatpush3.bf16.msra.mxu0 %v2613_v33 }
 0x647   : > { %2431 = vmatpush3.bf16.msra.mxu1 %v2606_v51  ;;  %2450 = vmatprep.subr.bf16.mxu0 %v2768_v1  ;;  %v2121_v1 = vld [vmem:[%s3268_s6 + $0x2] ss:$0 sm:$0xff] }
 0x64a   : > { %2433 = vmatmul.mubr.msk.bf16.vlgmr.msra.gmra.mrb[16].mxu1 %vm3047_vm14, %v2114_v55  ;;  %2451 = vmatpush3.bf16.msra.mxu0 %v2614_v34 }
 0x6fd   : > { %v1479_v57 = vpop.f32.mrb[12].mxu1 }
 0x6fe   : > { %v2394_v58 = vpop.f32.mrb[13].mxu1 }
 0x6ff   : > { %v1482_v59 = vpop.f32.mrb[14].mxu1 }
 0x700   : > { %v2395_v60 = vpop.f32.mrb[15].mxu1  ;;  %v1568_v61 = vpop.f32.mrb[16].mxu0 }
 0x701   : > { %v1569_v62 = vadd.f32 %v1568_v61, %v1479_v57  ;;  %v2414_v63 = vpop.f32.mrb[17].mxu0 }
 0x702   : > { %v1571_v0 = vpop.f32.mrb[18].mxu0 }
 0x703   : > { %v1572_v2 = vadd.f32 %v1571_v0, %v1482_v59  ;;  %v2415_v3 = vpop.f32.mrb[19].mxu0 }
 0x71d   : > { %v1681_v4 = vpop.f32.mrb[16].mxu1 }
 0x71e   : > { %v1688_v5 = vadd.f32 %v1681_v4, %v1569_v62  ;;  %v2434_v7 = vpop.f32.mrb[17].mxu1 }
 0x71f   : > { %v1684_v8 = vpop.f32.mrb[18].mxu1 }
 0x720   : > { %v1689_v6 = vadd.f32 %v1684_v8, %v1572_v2  ;;  %v2435_v11 = vpop.f32.mrb[19].mxu1  ;;  %v1698_v12 = vadd.f32 %v2117_v39, %v1688_v5 }
 0x722   : > { %v1700_v13 = vmax.f32 %v1698_v12, 0.0  ;;  %v1699_v14 = vadd.f32 %v2117_v39, %v1689_v6 }
 0x724   : > { %1702 = vadd.xlane.f32.xlu1 %v1700_v13  ;;  %v1701_v15 = vmax.f32 %v1699_v14, 0.0 }
 0x726   : > { %1704 = vadd.xlane.f32.xlu0 %v1701_v15 }
 0x7b1   : > { %v1703_v17 = vpop.xlane.xlu1 %1702 }
 0x7b2   : > { %v1706_v18 = vmul.f32 0.03125, %v1703_v17 }
 0x7b3   : > { %v1705_v19 = vpop.xlane.xlu0 %1704 }
 0x7b4   : > { %v1708_v20 = vsub.f32 %v1700_v13, %v1706_v18  ;;  %v1707_v21 = vmul.f32 0.03125, %v1705_v19 }
 0x7b6   : > { %v1709_v22 = vsub.f32 %v1701_v15, %v1707_v21  ;;  %v1710_v23 = vsel %vm548_vm15, %v1708_v20, 0.0 }
 0x7b7   : > { %v1712_v25 = vmul.f32 %v1710_v23, %v1710_v23 }
 0x7b8   : > { %v1711_v26 = vsel %vm548_vm15, %v1709_v22, 0.0 }
 0x7b9   : > { %1714 = vadd.xlane.f32.xlu1 %v1712_v25  ;;  %v1713_v27 = vmul.f32 %v1711_v26, %v1711_v26 }
 0x7bb   : > { %1716 = vadd.xlane.f32.xlu0 %v1713_v27 }
 0x846   : > { %v1715_v35 = vpop.xlane.xlu1 %1714 }
 0x847   : > { %v1718_v36 = vmul.f32 0.03125, %v1715_v35 }
 0x848   : > { %v1717_v40 = vpop.xlane.xlu0 %1716 }
 0x849   : > { %v1720_v41 = vadd.f32 1e-05, %v1718_v36  ;;  %v1719_v42 = vmul.f32 0.03125, %v1717_v40 }
 0x84b   : > { %2623 = vrsqrt.f32 %v1720_v41  ;;  %v1721_v43 = vadd.f32 1e-05, %v1719_v42 }
 0x84d   : > { %2625 = vrsqrt.f32 %v1721_v43 }
 0x855   : > { %v2624_v44 = vpop.eup %2623 }
 0x856   : > { %v1724_v9 = vmul.f32 %v2624_v44, %v1710_v23 }
 0x857   : > { %v2626_v46 = vpop.eup %2625 }
 0x858   : > { %v1725_v10 = vmul.f32 %v2626_v46, %v1711_v26  ;;  %v1734_v47 = vmul.f32 %v2119_v45, %v1724_v9 }
 0x85a   : > { %v1735_v48 = vmul.f32 %v2119_v45, %v1725_v10  ;;  %v1744_v49 = vadd.f32 %v2121_v1, %v1734_v47 }
 0x85c   : > { %v1745_v56 = vadd.f32 %v2121_v1, %v1735_v48  ;;  %v1746_v50 = vadd.f32 %v1744_v49, %v3152_v37 }
 0x85e   : > { %v1747_v51 = vadd.f32 %v1745_v56, %v3155_v38 }
 0x860   : > { %v1748_v52 = vpack.c.bf16 %v1747_v51, %v1746_v50 }
 0x862   : > { %2453 = vmatmul.mubr.bf16.vlgmr.msra.gmra.mrb[20].mxu0 %v1748_v52 }
 0x935   : > { %v1854_v54 = vpop.f32.mrb[20].mxu0 }
 0x936   : > { %v1855_v55 = vadd.f32 %v2122_v53, %v1854_v54  ;;  %v2454_v57 = vpop.f32.mrb[21].mxu0 }
 0x937   : > { %v1857_v58 = vpop.f32.mrb[22].mxu0 }
 0x938   : > { %v1858_v59 = vadd.f32 %v2122_v53, %v1857_v58  ;;  %v2455_v60 = vpop.f32.mrb[23].mxu0  ;;  %v1862_v61 = vsel %vm1861_vm0, %v1855_v55, -1e+30 }
 0x939   : > { %1864 = vmax.xlane.f32.xlu1 %v1862_v61 }
 0x93a   : > { %v1863_v37 = vsel %vm1861_vm0, %v1858_v59, -1e+30 }
 0x93b   : > { %1866 = vmax.xlane.f32.xlu0 %v1863_v37 }
 0x9c6   : > { %v1865_v38 = vpop.xlane.xlu1 %1864 }
 0x9c7   : > { %v1868_v62 = vsub.f32 %v1862_v61, %v1865_v38 }
 0x9c8   : > { %v1867_v63 = vpop.xlane.xlu0 %1866 }
 0x9c9   : > { %v1870_v0 = vmul.f32 1.442695, %v1868_v62  ;;  %v1869_v2 = vsub.f32 %v1863_v37, %v1867_v63 }
 0x9cb   : > { %2627 = vpow2.f32 %v1870_v0  ;;  %v1872_v3 = vmul.f32 1.442695, %v1869_v2 }
 0x9cd   : > { %2629 = vpow2.f32 %v1872_v3 }
 0x9d5   : > { %v2628_v24 = vpop.eup %2627 }
 0x9d6   : > { %1874 = vadd.xlane.f32.xlu1 %v2628_v24 }
 0x9d7   : > { %v2630_v4 = vpop.eup %2629 }
 0x9d8   : > { %1876 = vadd.xlane.f32.xlu0 %v2630_v4 }
 0xa63   : > { %v1875_v39 = vpop.xlane.xlu1 %1874 }
 0xa64   : > { %2631 = vrcp.f32 %v1875_v39 }
 0xa65   : > { %v1877_v5 = vpop.xlane.xlu0 %1876 }
 0xa66   : > { %2633 = vrcp.f32 %v1877_v5 }
 0xa6e   : > { %v2632_v7 = vpop.eup %2631 }
 0xa6f   : > { %v1880_v8 = vmul.f32 %v2632_v7, %v2628_v24 }
 0xa70   : > { %v2634_v6 = vpop.eup %2633 }
 0xa71   : > { %1882 = vst [vmem:[%s372_s24] sm:$0xff] %v1880_v8  ;;  %v1881_v11 = vmul.f32 %v2634_v6, %v2630_v4 }
 0xa73   : > { %1883 = vst [vmem:[%s372_s24 + $0x8] sm:$0xff] %v1881_v11 }
 0xa74   : > { %2704 = shalt.err (!%p2701_p11)
}
 0xa75   : > { %s2705_s25 = scalar_lea.hbm %s3217_s29, 256  ;;  %s2709_s15 = scalar_lea.hbm %s3271_s9, 512 }
 0xa76   : > { %p2706_p13 = scmp.ne.s32.totalorder %s3217_s29, %s2705_s25  ;;  %p2710_p6 = scmp.lt.u32.totalorder %s3217_s29, %s3271_s9 }
 0xa77   : > { %p2711_p9 = scmp.lt.u32.totalorder %s2709_s15, %s2705_s25  ;;  %p2713_p10 = scmp.lt.u32.totalorder %s2705_s25, %s3217_s29 }
 0xa78   : > { %p2707_p5 = pnand %p2706_p13, %p3294_p1 }
 0xa79   : > { %p2712_p12 = por %p2711_p9, %p2710_p6 }
 0xa7a   : > { %p2708_p0 = pneg %p2707_p5 }
 0xa7b   : > { %p2714_p2 = por %p2713_p10, %p2712_p12 }
 0xa7d   : > { %p2715_p3 = pnand %p2714_p2, %p2708_p0 }
 0xa7f   : > { %2718 = shalt.err (!%p2715_p3)
}
 0xa80   : > { %s2773_s24 = smov 128   ;;  %s2774_s27 = smov 8  }
 0xa81   : > { %2464 = dma.vmem_to_hbm [thread:$0]  (%p3294_p1), %s3219_s26, 256, %s3217_s29, %s3221_s14, %s2773_s24, %s2773_s24, %s2774_s27  }
 0xa82 PF: > { %p2481_p4 = scmp.ge.s32.totalorder %s2761_s12, 2  ;;  %s1913_s28 = sand.u32 1, %s2749_s30  }
 0xa83   : > { %p3295_p7 = scmp.ne.s32.totalorder %s3282_s20, 0  ;;  %s1914_s13 = scalar_lea.sflag [#allocation4], %s1913_s28 }
 0xa85   : > { %p2474_p8 = pnand %p2481_p4, %p3295_p7 }
 0xa87   : > { %2744 = dma.done.wait (!%p2474_p8), %s1914_s13, 256  }
 0xa88   : > { %2746 = vsyncadd (!%p2474_p8), %s1914_s13, 4294967040  ;;  %s3296_s12 = sld [smem:[#allocation12_spill]]  ;;  %s3297_s16 = sld [smem:[#allocation11_spill]] }
 0xa89   : > { %s3298_s11 = sld [smem:[#allocation13_spill]]  ;;  %s3299_s30 = smov %s2753_s10 }
 0xa8e   : > { %p21_p11 = scmp.ge.s32.totalorder %s3296_s12, 4   ;;  %s3300_s10 = smov %s3297_s16 }
 0xa90   :  { %23 = sbr.rel (!%p21_p11) target bundleno = 5 (0x5), region = 117 }
 0xa97   :  { %1919 = vsyncpa [#allocation3], 1 }
 0xa98   :  { %1921 = vsyncpa [#allocation3 + $0x1], 1 }
 0xa99   :  { %1922 = vsyncpa [#allocation6], 1 }
 0xa9a   :  { %1923 = vsyncpa [#allocation4], 1 }
 0xa9b   :  { %1925 = vsyncpa [#allocation4 + $0x1], 1 }

</bundles_post_ra>
